<compile_context>
chip_gen: v5e
topology: v5e:2x2
jax: 0.10.0
libtpu: 0.0.40
codegen_flags: <defaults>
</compile_context>

<pallas_src>
import functools

import jax
import jax.numpy as jnp
from jax import lax
from jax.experimental import pallas as pl
from jax.experimental.pallas import tpu as pltpu

# ----------------------------- small BERT config -----------------------------
HIDDEN = 32
N_HEADS = 2
HEAD_DIM = HIDDEN // N_HEADS
N_LAYERS = 2
INTERMEDIATE = 64
VOCAB = 64
VOCAB_PAD = 128           # classifier padded to a full vreg lane width
MAX_POS = 32
LANES = 128


# -------------------------- packed weight slab layout -------------------------
def _slab_layout():
    offs = {}
    row = 0

    def add(name, r, c):
        nonlocal row
        offs[name] = (row, r, c)
        row += ((r + 7) // 8) * 8          # keep every piece 8-sublane aligned

    add("tok_emb", VOCAB, HIDDEN)
    add("pos_type", MAX_POS, HIDDEN)        # pos_emb + token_type_emb[0]
    add("emb_ln", 2, HIDDEN)
    for l in range(N_LAYERS):
        add(f"w_qkv_{l}", HIDDEN, 3 * HIDDEN)
        add(f"b_qkv_{l}", 1, 3 * HIDDEN)
        add(f"w_o_{l}", HIDDEN, HIDDEN)
        add(f"b_o_{l}", 1, HIDDEN)
        add(f"ln1_{l}", 2, HIDDEN)
        add(f"w_i_{l}", HIDDEN, INTERMEDIATE)
        add(f"b_i_{l}", 1, INTERMEDIATE)
        add(f"w_f_{l}", INTERMEDIATE, HIDDEN)
        add(f"b_f_{l}", 1, HIDDEN)
        add(f"ln2_{l}", 2, HIDDEN)
    add("cls_w", HIDDEN, VOCAB_PAD)
    add("cls_b", 1, VOCAB_PAD)
    return offs, row


_OFFSETS, _SLAB_ROWS = _slab_layout()


# ------------------------------- kernel helpers -------------------------------
def _layernorm(x, ln_mat):
    # ln_mat: (2, H) -> row 0 = gamma, row 1 = beta
    g = ln_mat[0:1, :]
    b = ln_mat[1:2, :]
    mu = jnp.mean(x, axis=-1, keepdims=True)
    d = x - mu
    var = jnp.mean(d * d, axis=-1, keepdims=True)
    return d * lax.rsqrt(var + 1e-12) * g + b


def _gelu_tanh(x):
    return 0.5 * x * (1.0 + jnp.tanh(0.7978845608028654 * (x + 0.044715 * x * x * x)))


# ------------------------------- fused kernel --------------------------------
def _lm_kernel(*refs, training, mask_kind, seqs_per_block, seq_len):
    P, S = seqs_per_block, seq_len
    R = P * S

    if training:
        if mask_kind == "none":
            x_ref, y_ref, w_ref, sums_ref = refs
            mask_ref = None
        else:
            x_ref, mask_ref, y_ref, w_ref, sums_ref = refs
    else:
        x_ref, w_ref, probs_ref = refs
        mask_ref = None

    def W(name, rows=None):
        off, r, c = _OFFSETS[name]
        if rows is not None:
            r = rows
        return w_ref[off:off + r, :c]

    x_ids = x_ref[...]                                         # (R, 1) int32

    # token embedding as one-hot MXU matmul + resident pos+type rows
    onehot = (lax.broadcasted_iota(jnp.int32, (R, VOCAB), 1) == x_ids).astype(jnp.float32)
    pos = W("pos_type", rows=S)                                # (S, H)
    pos_all = pos if P == 1 else jnp.concatenate([pos] * P, axis=0)
    h = jnp.dot(onehot, W("tok_emb"), preferred_element_type=jnp.float32) + pos_all
    h = _layernorm(h, W("emb_ln"))

    # additive attention bias built in-kernel from the small int8 mask
    if mask_ref is not None:
        bias_all = (1.0 - mask_ref[...].astype(jnp.float32)) * -10000.0   # (P,S,S) / (P,1,S)
    else:
        bias_all = None

    scale = 1.0 / float(HEAD_DIM) ** 0.5
    for l in range(N_LAYERS):
        # fused QKV projection over the whole row block
        qkv = jnp.dot(h, W(f"w_qkv_{l}"), preferred_element_type=jnp.float32) + W(f"b_qkv_{l}")

        ctx_rows = []
        for p in range(P):                                     # static per-sequence attention
            bias = None if bias_all is None else bias_all[p]
            heads = []
            for hh in range(N_HEADS):
                q = qkv[p * S:(p + 1) * S, hh * HEAD_DIM:(hh + 1) * HEAD_DIM]
                k = qkv[p * S:(p + 1) * S, HIDDEN + hh * HEAD_DIM:HIDDEN + (hh + 1) * HEAD_DIM]
                v = qkv[p * S:(p + 1) * S, 2 * HIDDEN + hh * HEAD_DIM:2 * HIDDEN + (hh + 1) * HEAD_DIM]
                s = lax.dot_general(q, k, (((1,), (1,)), ((), ())),
                                    preferred_element_type=jnp.float32) * scale
                if bias is not None:
                    s = s + bias
                mx = jnp.max(s, axis=-1, keepdims=True)
                e = jnp.exp(s - mx)
                pw = e * pl.reciprocal(jnp.sum(e, axis=-1, keepdims=True), approx=True)
                heads.append(jnp.dot(pw, v, preferred_element_type=jnp.float32))   # (S, Dh)
            ctx_rows.append(jnp.concatenate(heads, axis=-1))                       # (S, H)
        ctx = ctx_rows[0] if P == 1 else jnp.concatenate(ctx_rows, axis=0)         # (R, H)

        # single fused out-projection + residual + LN epilogue
        attn = jnp.dot(ctx, W(f"w_o_{l}"), preferred_element_type=jnp.float32) + W(f"b_o_{l}")
        h = _layernorm(attn + h, W(f"ln1_{l}"))

        inter = _gelu_tanh(jnp.dot(h, W(f"w_i_{l}"), preferred_element_type=jnp.float32)
                           + W(f"b_i_{l}"))
        ffn = jnp.dot(inter, W(f"w_f_{l}"), preferred_element_type=jnp.float32) + W(f"b_f_{l}")
        h = _layernorm(ffn + h, W(f"ln2_{l}"))

    # classifier padded to 128 lanes; padded classes carry -1e9 bias -> exp == 0
    logits = jnp.dot(h, W("cls_w"), preferred_element_type=jnp.float32) + W("cls_b")  # (R, 128)

    if training:
        y = y_ref[...]                                          # (R, 1) int32
        mx = jnp.max(logits, axis=-1, keepdims=True)
        sh = logits - mx
        lse = jnp.log(jnp.sum(jnp.exp(sh), axis=-1, keepdims=True))
        logp = sh - lse
        hit = lax.broadcasted_iota(jnp.int32, logits.shape, 1) == y
        picked = jnp.sum(jnp.where(hit, logp, 0.0), axis=-1, keepdims=True)
        valid = (y != -1).astype(jnp.float32)                   # ignore_index = -1
        nll_sum = jnp.sum(-picked * valid)
        valid_sum = jnp.sum(valid)
        # lane-dense (1, 128) row: lane0 = sum(nll), lane1 = sum(valid)
        lane = lax.broadcasted_iota(jnp.int32, sums_ref.shape, 1)
        sums_ref[...] = jnp.where(lane == 0, nll_sum, 0.0) + jnp.where(lane == 1, valid_sum, 0.0)
    else:
        mx = jnp.max(logits, axis=-1, keepdims=True)
        e = jnp.exp(logits - mx)
        probs_ref[...] = e / jnp.sum(e, axis=-1, keepdims=True)  # exact normalization


# ----------------------------- parameters (glue) ------------------------------
def init_params(key):
    keys = jax.random.split(key, 4 + 4 * N_LAYERS)

    def nrm(k, shape):
        return 0.02 * jax.random.normal(k, shape, jnp.float32)

    def ln_pair():
        return jnp.stack([jnp.ones((HIDDEN,), jnp.float32),
                          jnp.zeros((HIDDEN,), jnp.float32)], axis=0)   # (2, H)

    p = {
        "tok_emb": nrm(keys[0], (VOCAB, HIDDEN)),
        "pos_emb": nrm(keys[1], (MAX_POS, HIDDEN)),
        "type_emb": nrm(keys[2], (2, HIDDEN)),
        "emb_ln": ln_pair(),
        "cls_w": nrm(keys[3], (HIDDEN, VOCAB)),
        "cls_b": jnp.zeros((1, VOCAB), jnp.float32),
    }
    ki = 4
    for l in range(N_LAYERS):
        p[f"w_qkv_{l}"] = nrm(keys[ki + 0], (HIDDEN, 3 * HIDDEN))
        p[f"b_qkv_{l}"] = jnp.zeros((1, 3 * HIDDEN), jnp.float32)
        p[f"w_o_{l}"] = nrm(keys[ki + 1], (HIDDEN, HIDDEN))
        p[f"b_o_{l}"] = jnp.zeros((1, HIDDEN), jnp.float32)
        p[f"ln1_{l}"] = ln_pair()
        p[f"w_i_{l}"] = nrm(keys[ki + 2], (HIDDEN, INTERMEDIATE))
        p[f"b_i_{l}"] = jnp.zeros((1, INTERMEDIATE), jnp.float32)
        p[f"w_f_{l}"] = nrm(keys[ki + 3], (INTERMEDIATE, HIDDEN))
        p[f"b_f_{l}"] = jnp.zeros((1, HIDDEN), jnp.float32)
        p[f"ln2_{l}"] = ln_pair()
        ki += 4
    return p


def pack_weights(params):
    """Pack all weights/biases/LN params into one 128-lane f32 slab."""
    arrs = dict(params)
    arrs["pos_type"] = params["pos_emb"] + params["type_emb"][0][None, :]
    arrs["cls_w"] = jnp.zeros((HIDDEN, VOCAB_PAD), jnp.float32).at[:, :VOCAB].set(params["cls_w"])
    # padded vocab lanes get a huge negative bias so they vanish from softmax/CE
    arrs["cls_b"] = jnp.full((1, VOCAB_PAD), -1e9, jnp.float32).at[:, :VOCAB].set(params["cls_b"])

    slab = jnp.zeros((_SLAB_ROWS, LANES), jnp.float32)
    for name, (off, r, c) in _OFFSETS.items():
        a = jnp.asarray(arrs[name], jnp.float32)
        slab = slab.at[off:off + r, :c].set(a)
    return slab


# ------------------------------ pallas_call glue -------------------------------
def language_model_forward(slab, x, mask=None, y=None):
    """Mirrors LanguageModel.forward: CE loss if y is given, else softmax probs."""
    B, S = x.shape
    assert S <= MAX_POS

    # sequences per block: as many whole sequences as fit ~128 rows and divide B
    max_seqs = max(1, 128 // S)
    P = 1
    for cand in range(min(B, max_seqs), 0, -1):
        if B % cand == 0:
            P = cand
            break
    NB = B // P
    R = P * S

    x2 = x.reshape(B * S, 1).astype(jnp.int32)
    slab_spec = pl.BlockSpec((_SLAB_ROWS, LANES), lambda b: (0, 0))   # resident weights
    cparams = pltpu.CompilerParams(dimension_semantics=("parallel",))

    if y is not None:
        y2 = y.reshape(B * S, 1).astype(jnp.int32)
        if mask is None:
            mask_kind, mask_args, mask_specs = "none", [], []
        else:
            m = (jnp.asarray(mask) != 0).astype(jnp.int8)
            if m.ndim == 2:                       # (B, S) key-padding mask
                mask_kind = "keys"
                m = m.reshape(B, 1, S)
                mask_specs = [pl.BlockSpec((P, 1, S), lambda b: (b, 0, 0))]
            else:                                 # full (B, S, S) attention mask
                mask_kind = "full"
                mask_specs = [pl.BlockSpec((P, S, S), lambda b: (b, 0, 0))]
            mask_args = [m]

        kernel = functools.partial(_lm_kernel, training=True, mask_kind=mask_kind,
                                   seqs_per_block=P, seq_len=S)
        sums = pl.pallas_call(
            kernel,
            out_shape=jax.ShapeDtypeStruct((NB, LANES), jnp.float32),
            grid=(NB,),
            in_specs=[pl.BlockSpec((R, 1), lambda b: (b, 0))] + mask_specs
                     + [pl.BlockSpec((R, 1), lambda b: (b, 0)), slab_spec],
            out_specs=pl.BlockSpec((1, LANES), lambda b: (b, 0)),
            compiler_params=cparams,
        )(x2, *mask_args, y2, slab)
        # mean over non-ignored tokens (CrossEntropyLoss(ignore_index=-1));
        # returns 0 (not nan) if every label is ignored.
        return jnp.sum(sums[:, 0]) / jnp.maximum(jnp.sum(sums[:, 1]), 1.0)

    # inference: original torch code calls bert(x) without a mask
    kernel = functools.partial(_lm_kernel, training=False, mask_kind="none",
                               seqs_per_block=P, seq_len=S)
    probs = pl.pallas_call(
        kernel,
        out_shape=jax.ShapeDtypeStruct((B * S, VOCAB_PAD), jnp.float32),
        grid=(NB,),
        in_specs=[pl.BlockSpec((R, 1), lambda b: (b, 0)), slab_spec],
        out_specs=pl.BlockSpec((R, VOCAB_PAD), lambda b: (b, 0)),
        compiler_params=cparams,
    )(x2, slab)
    return probs.reshape(B, S, VOCAB_PAD)[:, :, :VOCAB]


# ------------------------------------ main ------------------------------------
if __name__ == "__main__":
    key = jax.random.PRNGKey(0)
    k_param, k_x, k_y = jax.random.split(key, 3)
    params = init_params(k_param)
    slab = pack_weights(params)

    B, S = 2, 8
    x = jax.random.randint(k_x, (B, S), 0, VOCAB, dtype=jnp.int32)
    # SFT-style (B, S, S) attention mask (lower-triangular)
    tri = jnp.tril(jnp.ones((S, S), jnp.float32))
    mask = jnp.broadcast_to(tri[None], (B, S, S))
    y = jax.random.randint(k_y, (B, S), 0, VOCAB, dtype=jnp.int32)
    y = y.at[:, 0].set(-1)  # some ignored targets

    infer_fn = jax.jit(lambda w, xx: language_model_forward(w, xx))
    train_fn = jax.jit(lambda w, xx, mm, yy: language_model_forward(w, xx, mask=mm, y=yy))

    probs = infer_fn(slab, x)             # inference branch (no mask, softmax probs)
    loss = train_fn(slab, x, mask, y)     # training branch (mask + CE loss)
    jax.block_until_ready((probs, loss))

    assert probs.shape == (B, S, VOCAB)
    assert jnp.all(jnp.isfinite(probs)) and jnp.isfinite(loss)
    assert jnp.allclose(jnp.sum(probs, axis=-1), 1.0, atol=1e-3)
    print("KERNEL_OK")
</pallas_src>

<mosaic_0001>
module attributes {stable_mosaic.version = 11 : i64} {
  func.func @_lm_kernel(%arg0: i32, %arg1: memref<16x1xi32, #tpu.memory_space<vmem>>, %arg2: memref<560x128xf32, #tpu.memory_space<vmem>>, %arg3: memref<16x128xf32, #tpu.memory_space<vmem>>) attributes {dimension_semantics = [#tpu.dimension_semantics<parallel>], iteration_bounds = array<i64: 1>, scalar_prefetch = 0 : i64, scratch_operands = 0 : i64, tpu.core_type = #tpu.core_type<tc>, window_params = [{transform_indices = @transform_0, window_bounds = array<i64: 16, 1>}, {pipeline_mode = #tpu.pipeline_mode<synchronous>, transform_indices = @transform_1, window_bounds = array<i64: 560, 128>}, {transform_indices = @transform_2, window_bounds = array<i64: 16, 128>}]} {
    %c0 = arith.constant 0 : index
    %c0_0 = arith.constant 0 : index
    %0 = vector.load %arg1[%c0, %c0_0] : memref<16x1xi32, #tpu.memory_space<vmem>>, vector<16x1xi32>
    %1 = tpu.iota {dimensions = array<i32: 1>} : vector<16x64xi32>
    %2 = vector.broadcast %0 : vector<16x1xi32> to vector<16x64xi32>
    %3 = arith.cmpi eq, %1, %2 : vector<16x64xi32>
    %4 = arith.extui %3 : vector<16x64xi1> to vector<16x64xi32>
    %5 = arith.sitofp %4 : vector<16x64xi32> to vector<16x64xf32>
    %c64 = arith.constant 64 : index
    %c0_1 = arith.constant 0 : index
    %6 = vector.load %arg2[%c64, %c0_1] : memref<560x128xf32, #tpu.memory_space<vmem>>, vector<8x32xf32>
    %7 = tpu.concatenate %6, %6 in 0 : vector<8x32xf32>, vector<8x32xf32> -> vector<16x32xf32>
    %c0_2 = arith.constant 0 : index
    %c0_3 = arith.constant 0 : index
    %8 = vector.load %arg2[%c0_2, %c0_3] : memref<560x128xf32, #tpu.memory_space<vmem>>, vector<64x32xf32>
    %cst = arith.constant dense<0.000000e+00> : vector<16x32xf32>
    %9 = tpu.matmul %5, %8, %cst {dimension_numbers = #tpu.dot_dimension_numbers<[1], [0], [0], [1], [0, 0, 1, 1], [], []>} : vector<16x64xf32>, vector<64x32xf32>, vector<16x32xf32> -> vector<16x32xf32>
    %10 = arith.addf %9, %7 : vector<16x32xf32>
    %c96 = arith.constant 96 : index
    %c0_4 = arith.constant 0 : index
    %11 = vector.load %arg2[%c96, %c0_4] : memref<560x128xf32, #tpu.memory_space<vmem>>, vector<2x32xf32>
    %12 = vector.extract_strided_slice %11 {offsets = [0, 0], sizes = [1, 32], strides = [1, 1]} : vector<2x32xf32> to vector<1x32xf32>
    %13 = vector.extract_strided_slice %11 {offsets = [1, 0], sizes = [1, 32], strides = [1, 1]} : vector<2x32xf32> to vector<1x32xf32>
    %cst_5 = arith.constant dense<0.000000e+00> : vector<16xf32>
    %14 = vector.multi_reduction <add>, %10, %cst_5 [1] : vector<16x32xf32> to vector<16xf32>
    %15 = vector.shape_cast %14 : vector<16xf32> to vector<16x1xf32>
    %cst_6 = arith.constant 3.200000e+01 : f32
    %16 = vector.broadcast %cst_6 : f32 to vector<16x1xf32>
    %17 = arith.divf %15, %16 : vector<16x1xf32>
    %18 = vector.broadcast %17 : vector<16x1xf32> to vector<16x32xf32>
    %19 = arith.subf %10, %18 : vector<16x32xf32>
    %20 = arith.mulf %19, %19 : vector<16x32xf32>
    %cst_7 = arith.constant dense<0.000000e+00> : vector<16xf32>
    %21 = vector.multi_reduction <add>, %20, %cst_7 [1] : vector<16x32xf32> to vector<16xf32>
    %22 = vector.shape_cast %21 : vector<16xf32> to vector<16x1xf32>
    %cst_8 = arith.constant 3.200000e+01 : f32
    %23 = vector.broadcast %cst_8 : f32 to vector<16x1xf32>
    %24 = arith.divf %22, %23 : vector<16x1xf32>
    %cst_9 = arith.constant 9.99999996E-13 : f32
    %25 = vector.broadcast %cst_9 : f32 to vector<16x1xf32>
    %26 = arith.addf %24, %25 : vector<16x1xf32>
    %27 = math.rsqrt %26 : vector<16x1xf32>
    %28 = vector.broadcast %27 : vector<16x1xf32> to vector<16x32xf32>
    %29 = arith.mulf %19, %28 : vector<16x32xf32>
    %30 = vector.broadcast %12 : vector<1x32xf32> to vector<16x32xf32>
    %31 = arith.mulf %29, %30 : vector<16x32xf32>
    %32 = vector.broadcast %13 : vector<1x32xf32> to vector<16x32xf32>
    %33 = arith.addf %31, %32 : vector<16x32xf32>
    %c104 = arith.constant 104 : index
    %c0_10 = arith.constant 0 : index
    %34 = vector.load %arg2[%c104, %c0_10] : memref<560x128xf32, #tpu.memory_space<vmem>>, vector<32x96xf32>
    %cst_11 = arith.constant dense<0.000000e+00> : vector<16x96xf32>
    %35 = tpu.matmul %33, %34, %cst_11 {dimension_numbers = #tpu.dot_dimension_numbers<[1], [0], [0], [1], [0, 0, 1, 1], [], []>} : vector<16x32xf32>, vector<32x96xf32>, vector<16x96xf32> -> vector<16x96xf32>
    %c136 = arith.constant 136 : index
    %c0_12 = arith.constant 0 : index
    %36 = vector.load %arg2[%c136, %c0_12] : memref<560x128xf32, #tpu.memory_space<vmem>>, vector<1x96xf32>
    %37 = vector.broadcast %36 : vector<1x96xf32> to vector<16x96xf32>
    %38 = arith.addf %35, %37 : vector<16x96xf32>
    %39 = vector.extract_strided_slice %38 {offsets = [0, 0], sizes = [8, 16], strides = [1, 1]} : vector<16x96xf32> to vector<8x16xf32>
    %40 = vector.extract_strided_slice %38 {offsets = [0, 32], sizes = [8, 16], strides = [1, 1]} : vector<16x96xf32> to vector<8x16xf32>
    %41 = vector.extract_strided_slice %38 {offsets = [0, 64], sizes = [8, 16], strides = [1, 1]} : vector<16x96xf32> to vector<8x16xf32>
    %cst_13 = arith.constant dense<0.000000e+00> : vector<8x8xf32>
    %42 = tpu.matmul %39, %40, %cst_13 {dimension_numbers = #tpu.dot_dimension_numbers<[1], [1], [0], [0], [0, 0, 1, 0], [], []>} : vector<8x16xf32>, vector<8x16xf32>, vector<8x8xf32> -> vector<8x8xf32>
    %cst_14 = arith.constant 2.500000e-01 : f32
    %43 = vector.broadcast %cst_14 : f32 to vector<8x8xf32>
    %44 = arith.mulf %42, %43 : vector<8x8xf32>
    %cst_15 = arith.constant dense<0xFF800000> : vector<8xf32>
    %45 = vector.multi_reduction <maximumf>, %44, %cst_15 [1] : vector<8x8xf32> to vector<8xf32>
    %46 = vector.shape_cast %45 : vector<8xf32> to vector<8x1xf32>
    %47 = vector.broadcast %46 : vector<8x1xf32> to vector<8x8xf32>
    %48 = arith.subf %44, %47 : vector<8x8xf32>
    %49 = math.exp %48 : vector<8x8xf32>
    %cst_16 = arith.constant dense<0.000000e+00> : vector<8xf32>
    %50 = vector.multi_reduction <add>, %49, %cst_16 [1] : vector<8x8xf32> to vector<8xf32>
    %51 = vector.shape_cast %50 : vector<8xf32> to vector<8x1xf32>
    %52 = tpu.reciprocal %51 {approx = true} : vector<8x1xf32> -> vector<8x1xf32>
    %53 = vector.broadcast %52 : vector<8x1xf32> to vector<8x8xf32>
    %54 = arith.mulf %49, %53 : vector<8x8xf32>
    %cst_17 = arith.constant dense<0.000000e+00> : vector<8x16xf32>
    %55 = tpu.matmul %54, %41, %cst_17 {dimension_numbers = #tpu.dot_dimension_numbers<[1], [0], [0], [1], [0, 0, 1, 1], [], []>} : vector<8x8xf32>, vector<8x16xf32>, vector<8x16xf32> -> vector<8x16xf32>
    %56 = vector.extract_strided_slice %38 {offsets = [0, 16], sizes = [8, 16], strides = [1, 1]} : vector<16x96xf32> to vector<8x16xf32>
    %57 = vector.extract_strided_slice %38 {offsets = [0, 48], sizes = [8, 16], strides = [1, 1]} : vector<16x96xf32> to vector<8x16xf32>
    %58 = vector.extract_strided_slice %38 {offsets = [0, 80], sizes = [8, 16], strides = [1, 1]} : vector<16x96xf32> to vector<8x16xf32>
    %cst_18 = arith.constant dense<0.000000e+00> : vector<8x8xf32>
    %59 = tpu.matmul %56, %57, %cst_18 {dimension_numbers = #tpu.dot_dimension_numbers<[1], [1], [0], [0], [0, 0, 1, 0], [], []>} : vector<8x16xf32>, vector<8x16xf32>, vector<8x8xf32> -> vector<8x8xf32>
    %cst_19 = arith.constant 2.500000e-01 : f32
    %60 = vector.broadcast %cst_19 : f32 to vector<8x8xf32>
    %61 = arith.mulf %59, %60 : vector<8x8xf32>
    %cst_20 = arith.constant dense<0xFF800000> : vector<8xf32>
    %62 = vector.multi_reduction <maximumf>, %61, %cst_20 [1] : vector<8x8xf32> to vector<8xf32>
    %63 = vector.shape_cast %62 : vector<8xf32> to vector<8x1xf32>
    %64 = vector.broadcast %63 : vector<8x1xf32> to vector<8x8xf32>
    %65 = arith.subf %61, %64 : vector<8x8xf32>
    %66 = math.exp %65 : vector<8x8xf32>
    %cst_21 = arith.constant dense<0.000000e+00> : vector<8xf32>
    %67 = vector.multi_reduction <add>, %66, %cst_21 [1] : vector<8x8xf32> to vector<8xf32>
    %68 = vector.shape_cast %67 : vector<8xf32> to vector<8x1xf32>
    %69 = tpu.reciprocal %68 {approx = true} : vector<8x1xf32> -> vector<8x1xf32>
    %70 = vector.broadcast %69 : vector<8x1xf32> to vector<8x8xf32>
    %71 = arith.mulf %66, %70 : vector<8x8xf32>
    %cst_22 = arith.constant dense<0.000000e+00> : vector<8x16xf32>
    %72 = tpu.matmul %71, %58, %cst_22 {dimension_numbers = #tpu.dot_dimension_numbers<[1], [0], [0], [1], [0, 0, 1, 1], [], []>} : vector<8x8xf32>, vector<8x16xf32>, vector<8x16xf32> -> vector<8x16xf32>
    %73 = tpu.concatenate %55, %72 in 1 : vector<8x16xf32>, vector<8x16xf32> -> vector<8x32xf32>
    %74 = vector.extract_strided_slice %38 {offsets = [8, 0], sizes = [8, 16], strides = [1, 1]} : vector<16x96xf32> to vector<8x16xf32>
    %75 = vector.extract_strided_slice %38 {offsets = [8, 32], sizes = [8, 16], strides = [1, 1]} : vector<16x96xf32> to vector<8x16xf32>
    %76 = vector.extract_strided_slice %38 {offsets = [8, 64], sizes = [8, 16], strides = [1, 1]} : vector<16x96xf32> to vector<8x16xf32>
    %cst_23 = arith.constant dense<0.000000e+00> : vector<8x8xf32>
    %77 = tpu.matmul %74, %75, %cst_23 {dimension_numbers = #tpu.dot_dimension_numbers<[1], [1], [0], [0], [0, 0, 1, 0], [], []>} : vector<8x16xf32>, vector<8x16xf32>, vector<8x8xf32> -> vector<8x8xf32>
    %cst_24 = arith.constant 2.500000e-01 : f32
    %78 = vector.broadcast %cst_24 : f32 to vector<8x8xf32>
    %79 = arith.mulf %77, %78 : vector<8x8xf32>
    %cst_25 = arith.constant dense<0xFF800000> : vector<8xf32>
    %80 = vector.multi_reduction <maximumf>, %79, %cst_25 [1] : vector<8x8xf32> to vector<8xf32>
    %81 = vector.shape_cast %80 : vector<8xf32> to vector<8x1xf32>
    %82 = vector.broadcast %81 : vector<8x1xf32> to vector<8x8xf32>
    %83 = arith.subf %79, %82 : vector<8x8xf32>
    %84 = math.exp %83 : vector<8x8xf32>
    %cst_26 = arith.constant dense<0.000000e+00> : vector<8xf32>
    %85 = vector.multi_reduction <add>, %84, %cst_26 [1] : vector<8x8xf32> to vector<8xf32>
    %86 = vector.shape_cast %85 : vector<8xf32> to vector<8x1xf32>
    %87 = tpu.reciprocal %86 {approx = true} : vector<8x1xf32> -> vector<8x1xf32>
    %88 = vector.broadcast %87 : vector<8x1xf32> to vector<8x8xf32>
    %89 = arith.mulf %84, %88 : vector<8x8xf32>
    %cst_27 = arith.constant dense<0.000000e+00> : vector<8x16xf32>
    %90 = tpu.matmul %89, %76, %cst_27 {dimension_numbers = #tpu.dot_dimension_numbers<[1], [0], [0], [1], [0, 0, 1, 1], [], []>} : vector<8x8xf32>, vector<8x16xf32>, vector<8x16xf32> -> vector<8x16xf32>
    %91 = vector.extract_strided_slice %38 {offsets = [8, 16], sizes = [8, 16], strides = [1, 1]} : vector<16x96xf32> to vector<8x16xf32>
    %92 = vector.extract_strided_slice %38 {offsets = [8, 48], sizes = [8, 16], strides = [1, 1]} : vector<16x96xf32> to vector<8x16xf32>
    %93 = vector.extract_strided_slice %38 {offsets = [8, 80], sizes = [8, 16], strides = [1, 1]} : vector<16x96xf32> to vector<8x16xf32>
    %cst_28 = arith.constant dense<0.000000e+00> : vector<8x8xf32>
    %94 = tpu.matmul %91, %92, %cst_28 {dimension_numbers = #tpu.dot_dimension_numbers<[1], [1], [0], [0], [0, 0, 1, 0], [], []>} : vector<8x16xf32>, vector<8x16xf32>, vector<8x8xf32> -> vector<8x8xf32>
    %cst_29 = arith.constant 2.500000e-01 : f32
    %95 = vector.broadcast %cst_29 : f32 to vector<8x8xf32>
    %96 = arith.mulf %94, %95 : vector<8x8xf32>
    %cst_30 = arith.constant dense<0xFF800000> : vector<8xf32>
    %97 = vector.multi_reduction <maximumf>, %96, %cst_30 [1] : vector<8x8xf32> to vector<8xf32>
    %98 = vector.shape_cast %97 : vector<8xf32> to vector<8x1xf32>
    %99 = vector.broadcast %98 : vector<8x1xf32> to vector<8x8xf32>
    %100 = arith.subf %96, %99 : vector<8x8xf32>
    %101 = math.exp %100 : vector<8x8xf32>
    %cst_31 = arith.constant dense<0.000000e+00> : vector<8xf32>
    %102 = vector.multi_reduction <add>, %101, %cst_31 [1] : vector<8x8xf32> to vector<8xf32>
    %103 = vector.shape_cast %102 : vector<8xf32> to vector<8x1xf32>
    %104 = tpu.reciprocal %103 {approx = true} : vector<8x1xf32> -> vector<8x1xf32>
    %105 = vector.broadcast %104 : vector<8x1xf32> to vector<8x8xf32>
    %106 = arith.mulf %101, %105 : vector<8x8xf32>
    %cst_32 = arith.constant dense<0.000000e+00> : vector<8x16xf32>
    %107 = tpu.matmul %106, %93, %cst_32 {dimension_numbers = #tpu.dot_dimension_numbers<[1], [0], [0], [1], [0, 0, 1, 1], [], []>} : vector<8x8xf32>, vector<8x16xf32>, vector<8x16xf32> -> vector<8x16xf32>
    %108 = tpu.concatenate %90, %107 in 1 : vector<8x16xf32>, vector<8x16xf32> -> vector<8x32xf32>
    %109 = tpu.concatenate %73, %108 in 0 : vector<8x32xf32>, vector<8x32xf32> -> vector<16x32xf32>
    %c144 = arith.constant 144 : index
    %c0_33 = arith.constant 0 : index
    %110 = vector.load %arg2[%c144, %c0_33] : memref<560x128xf32, #tpu.memory_space<vmem>>, vector<32x32xf32>
    %cst_34 = arith.constant dense<0.000000e+00> : vector<16x32xf32>
    %111 = tpu.matmul %109, %110, %cst_34 {dimension_numbers = #tpu.dot_dimension_numbers<[1], [0], [0], [1], [0, 0, 1, 1], [], []>} : vector<16x32xf32>, vector<32x32xf32>, vector<16x32xf32> -> vector<16x32xf32>
    %c176 = arith.constant 176 : index
    %c0_35 = arith.constant 0 : index
    %112 = vector.load %arg2[%c176, %c0_35] : memref<560x128xf32, #tpu.memory_space<vmem>>, vector<1x32xf32>
    %113 = vector.broadcast %112 : vector<1x32xf32> to vector<16x32xf32>
    %114 = arith.addf %111, %113 : vector<16x32xf32>
    %115 = arith.addf %114, %33 : vector<16x32xf32>
    %c184 = arith.constant 184 : index
    %c0_36 = arith.constant 0 : index
    %116 = vector.load %arg2[%c184, %c0_36] : memref<560x128xf32, #tpu.memory_space<vmem>>, vector<2x32xf32>
    %117 = vector.extract_strided_slice %116 {offsets = [0, 0], sizes = [1, 32], strides = [1, 1]} : vector<2x32xf32> to vector<1x32xf32>
    %118 = vector.extract_strided_slice %116 {offsets = [1, 0], sizes = [1, 32], strides = [1, 1]} : vector<2x32xf32> to vector<1x32xf32>
    %cst_37 = arith.constant dense<0.000000e+00> : vector<16xf32>
    %119 = vector.multi_reduction <add>, %115, %cst_37 [1] : vector<16x32xf32> to vector<16xf32>
    %120 = vector.shape_cast %119 : vector<16xf32> to vector<16x1xf32>
    %cst_38 = arith.constant 3.200000e+01 : f32
    %121 = vector.broadcast %cst_38 : f32 to vector<16x1xf32>
    %122 = arith.divf %120, %121 : vector<16x1xf32>
    %123 = vector.broadcast %122 : vector<16x1xf32> to vector<16x32xf32>
    %124 = arith.subf %115, %123 : vector<16x32xf32>
    %125 = arith.mulf %124, %124 : vector<16x32xf32>
    %cst_39 = arith.constant dense<0.000000e+00> : vector<16xf32>
    %126 = vector.multi_reduction <add>, %125, %cst_39 [1] : vector<16x32xf32> to vector<16xf32>
    %127 = vector.shape_cast %126 : vector<16xf32> to vector<16x1xf32>
    %cst_40 = arith.constant 3.200000e+01 : f32
    %128 = vector.broadcast %cst_40 : f32 to vector<16x1xf32>
    %129 = arith.divf %127, %128 : vector<16x1xf32>
    %cst_41 = arith.constant 9.99999996E-13 : f32
    %130 = vector.broadcast %cst_41 : f32 to vector<16x1xf32>
    %131 = arith.addf %129, %130 : vector<16x1xf32>
    %132 = math.rsqrt %131 : vector<16x1xf32>
    %133 = vector.broadcast %132 : vector<16x1xf32> to vector<16x32xf32>
    %134 = arith.mulf %124, %133 : vector<16x32xf32>
    %135 = vector.broadcast %117 : vector<1x32xf32> to vector<16x32xf32>
    %136 = arith.mulf %134, %135 : vector<16x32xf32>
    %137 = vector.broadcast %118 : vector<1x32xf32> to vector<16x32xf32>
    %138 = arith.addf %136, %137 : vector<16x32xf32>
    %c192 = arith.constant 192 : index
    %c0_42 = arith.constant 0 : index
    %139 = vector.load %arg2[%c192, %c0_42] : memref<560x128xf32, #tpu.memory_space<vmem>>, vector<32x64xf32>
    %cst_43 = arith.constant dense<0.000000e+00> : vector<16x64xf32>
    %140 = tpu.matmul %138, %139, %cst_43 {dimension_numbers = #tpu.dot_dimension_numbers<[1], [0], [0], [1], [0, 0, 1, 1], [], []>} : vector<16x32xf32>, vector<32x64xf32>, vector<16x64xf32> -> vector<16x64xf32>
    %c224 = arith.constant 224 : index
    %c0_44 = arith.constant 0 : index
    %141 = vector.load %arg2[%c224, %c0_44] : memref<560x128xf32, #tpu.memory_space<vmem>>, vector<1x64xf32>
    %142 = vector.broadcast %141 : vector<1x64xf32> to vector<16x64xf32>
    %143 = arith.addf %140, %142 : vector<16x64xf32>
    %cst_45 = arith.constant 5.000000e-01 : f32
    %144 = vector.broadcast %cst_45 : f32 to vector<16x64xf32>
    %145 = arith.mulf %144, %143 : vector<16x64xf32>
    %cst_46 = arith.constant 4.471500e-02 : f32
    %146 = vector.broadcast %cst_46 : f32 to vector<16x64xf32>
    %147 = arith.mulf %146, %143 : vector<16x64xf32>
    %148 = arith.mulf %147, %143 : vector<16x64xf32>
    %149 = arith.mulf %148, %143 : vector<16x64xf32>
    %150 = arith.addf %143, %149 : vector<16x64xf32>
    %cst_47 = arith.constant 0.797884583 : f32
    %151 = vector.broadcast %cst_47 : f32 to vector<16x64xf32>
    %152 = arith.mulf %151, %150 : vector<16x64xf32>
    %153 = math.tanh %152 : vector<16x64xf32>
    %cst_48 = arith.constant 1.000000e+00 : f32
    %154 = vector.broadcast %cst_48 : f32 to vector<16x64xf32>
    %155 = arith.addf %154, %153 : vector<16x64xf32>
    %156 = arith.mulf %145, %155 : vector<16x64xf32>
    %c232 = arith.constant 232 : index
    %c0_49 = arith.constant 0 : index
    %157 = vector.load %arg2[%c232, %c0_49] : memref<560x128xf32, #tpu.memory_space<vmem>>, vector<64x32xf32>
    %cst_50 = arith.constant dense<0.000000e+00> : vector<16x32xf32>
    %158 = tpu.matmul %156, %157, %cst_50 {dimension_numbers = #tpu.dot_dimension_numbers<[1], [0], [0], [1], [0, 0, 1, 1], [], []>} : vector<16x64xf32>, vector<64x32xf32>, vector<16x32xf32> -> vector<16x32xf32>
    %c296 = arith.constant 296 : index
    %c0_51 = arith.constant 0 : index
    %159 = vector.load %arg2[%c296, %c0_51] : memref<560x128xf32, #tpu.memory_space<vmem>>, vector<1x32xf32>
    %160 = vector.broadcast %159 : vector<1x32xf32> to vector<16x32xf32>
    %161 = arith.addf %158, %160 : vector<16x32xf32>
    %162 = arith.addf %161, %138 : vector<16x32xf32>
    %c304 = arith.constant 304 : index
    %c0_52 = arith.constant 0 : index
    %163 = vector.load %arg2[%c304, %c0_52] : memref<560x128xf32, #tpu.memory_space<vmem>>, vector<2x32xf32>
    %164 = vector.extract_strided_slice %163 {offsets = [0, 0], sizes = [1, 32], strides = [1, 1]} : vector<2x32xf32> to vector<1x32xf32>
    %165 = vector.extract_strided_slice %163 {offsets = [1, 0], sizes = [1, 32], strides = [1, 1]} : vector<2x32xf32> to vector<1x32xf32>
    %cst_53 = arith.constant dense<0.000000e+00> : vector<16xf32>
    %166 = vector.multi_reduction <add>, %162, %cst_53 [1] : vector<16x32xf32> to vector<16xf32>
    %167 = vector.shape_cast %166 : vector<16xf32> to vector<16x1xf32>
    %cst_54 = arith.constant 3.200000e+01 : f32
    %168 = vector.broadcast %cst_54 : f32 to vector<16x1xf32>
    %169 = arith.divf %167, %168 : vector<16x1xf32>
    %170 = vector.broadcast %169 : vector<16x1xf32> to vector<16x32xf32>
    %171 = arith.subf %162, %170 : vector<16x32xf32>
    %172 = arith.mulf %171, %171 : vector<16x32xf32>
    %cst_55 = arith.constant dense<0.000000e+00> : vector<16xf32>
    %173 = vector.multi_reduction <add>, %172, %cst_55 [1] : vector<16x32xf32> to vector<16xf32>
    %174 = vector.shape_cast %173 : vector<16xf32> to vector<16x1xf32>
    %cst_56 = arith.constant 3.200000e+01 : f32
    %175 = vector.broadcast %cst_56 : f32 to vector<16x1xf32>
    %176 = arith.divf %174, %175 : vector<16x1xf32>
    %cst_57 = arith.constant 9.99999996E-13 : f32
    %177 = vector.broadcast %cst_57 : f32 to vector<16x1xf32>
    %178 = arith.addf %176, %177 : vector<16x1xf32>
    %179 = math.rsqrt %178 : vector<16x1xf32>
    %180 = vector.broadcast %179 : vector<16x1xf32> to vector<16x32xf32>
    %181 = arith.mulf %171, %180 : vector<16x32xf32>
    %182 = vector.broadcast %164 : vector<1x32xf32> to vector<16x32xf32>
    %183 = arith.mulf %181, %182 : vector<16x32xf32>
    %184 = vector.broadcast %165 : vector<1x32xf32> to vector<16x32xf32>
    %185 = arith.addf %183, %184 : vector<16x32xf32>
    %c312 = arith.constant 312 : index
    %c0_58 = arith.constant 0 : index
    %186 = vector.load %arg2[%c312, %c0_58] : memref<560x128xf32, #tpu.memory_space<vmem>>, vector<32x96xf32>
    %cst_59 = arith.constant dense<0.000000e+00> : vector<16x96xf32>
    %187 = tpu.matmul %185, %186, %cst_59 {dimension_numbers = #tpu.dot_dimension_numbers<[1], [0], [0], [1], [0, 0, 1, 1], [], []>} : vector<16x32xf32>, vector<32x96xf32>, vector<16x96xf32> -> vector<16x96xf32>
    %c344 = arith.constant 344 : index
    %c0_60 = arith.constant 0 : index
    %188 = vector.load %arg2[%c344, %c0_60] : memref<560x128xf32, #tpu.memory_space<vmem>>, vector<1x96xf32>
    %189 = vector.broadcast %188 : vector<1x96xf32> to vector<16x96xf32>
    %190 = arith.addf %187, %189 : vector<16x96xf32>
    %191 = vector.extract_strided_slice %190 {offsets = [0, 0], sizes = [8, 16], strides = [1, 1]} : vector<16x96xf32> to vector<8x16xf32>
    %192 = vector.extract_strided_slice %190 {offsets = [0, 32], sizes = [8, 16], strides = [1, 1]} : vector<16x96xf32> to vector<8x16xf32>
    %193 = vector.extract_strided_slice %190 {offsets = [0, 64], sizes = [8, 16], strides = [1, 1]} : vector<16x96xf32> to vector<8x16xf32>
    %cst_61 = arith.constant dense<0.000000e+00> : vector<8x8xf32>
    %194 = tpu.matmul %191, %192, %cst_61 {dimension_numbers = #tpu.dot_dimension_numbers<[1], [1], [0], [0], [0, 0, 1, 0], [], []>} : vector<8x16xf32>, vector<8x16xf32>, vector<8x8xf32> -> vector<8x8xf32>
    %cst_62 = arith.constant 2.500000e-01 : f32
    %195 = vector.broadcast %cst_62 : f32 to vector<8x8xf32>
    %196 = arith.mulf %194, %195 : vector<8x8xf32>
    %cst_63 = arith.constant dense<0xFF800000> : vector<8xf32>
    %197 = vector.multi_reduction <maximumf>, %196, %cst_63 [1] : vector<8x8xf32> to vector<8xf32>
    %198 = vector.shape_cast %197 : vector<8xf32> to vector<8x1xf32>
    %199 = vector.broadcast %198 : vector<8x1xf32> to vector<8x8xf32>
    %200 = arith.subf %196, %199 : vector<8x8xf32>
    %201 = math.exp %200 : vector<8x8xf32>
    %cst_64 = arith.constant dense<0.000000e+00> : vector<8xf32>
    %202 = vector.multi_reduction <add>, %201, %cst_64 [1] : vector<8x8xf32> to vector<8xf32>
    %203 = vector.shape_cast %202 : vector<8xf32> to vector<8x1xf32>
    %204 = tpu.reciprocal %203 {approx = true} : vector<8x1xf32> -> vector<8x1xf32>
    %205 = vector.broadcast %204 : vector<8x1xf32> to vector<8x8xf32>
    %206 = arith.mulf %201, %205 : vector<8x8xf32>
    %cst_65 = arith.constant dense<0.000000e+00> : vector<8x16xf32>
    %207 = tpu.matmul %206, %193, %cst_65 {dimension_numbers = #tpu.dot_dimension_numbers<[1], [0], [0], [1], [0, 0, 1, 1], [], []>} : vector<8x8xf32>, vector<8x16xf32>, vector<8x16xf32> -> vector<8x16xf32>
    %208 = vector.extract_strided_slice %190 {offsets = [0, 16], sizes = [8, 16], strides = [1, 1]} : vector<16x96xf32> to vector<8x16xf32>
    %209 = vector.extract_strided_slice %190 {offsets = [0, 48], sizes = [8, 16], strides = [1, 1]} : vector<16x96xf32> to vector<8x16xf32>
    %210 = vector.extract_strided_slice %190 {offsets = [0, 80], sizes = [8, 16], strides = [1, 1]} : vector<16x96xf32> to vector<8x16xf32>
    %cst_66 = arith.constant dense<0.000000e+00> : vector<8x8xf32>
    %211 = tpu.matmul %208, %209, %cst_66 {dimension_numbers = #tpu.dot_dimension_numbers<[1], [1], [0], [0], [0, 0, 1, 0], [], []>} : vector<8x16xf32>, vector<8x16xf32>, vector<8x8xf32> -> vector<8x8xf32>
    %cst_67 = arith.constant 2.500000e-01 : f32
    %212 = vector.broadcast %cst_67 : f32 to vector<8x8xf32>
    %213 = arith.mulf %211, %212 : vector<8x8xf32>
    %cst_68 = arith.constant dense<0xFF800000> : vector<8xf32>
    %214 = vector.multi_reduction <maximumf>, %213, %cst_68 [1] : vector<8x8xf32> to vector<8xf32>
    %215 = vector.shape_cast %214 : vector<8xf32> to vector<8x1xf32>
    %216 = vector.broadcast %215 : vector<8x1xf32> to vector<8x8xf32>
    %217 = arith.subf %213, %216 : vector<8x8xf32>
    %218 = math.exp %217 : vector<8x8xf32>
    %cst_69 = arith.constant dense<0.000000e+00> : vector<8xf32>
    %219 = vector.multi_reduction <add>, %218, %cst_69 [1] : vector<8x8xf32> to vector<8xf32>
    %220 = vector.shape_cast %219 : vector<8xf32> to vector<8x1xf32>
    %221 = tpu.reciprocal %220 {approx = true} : vector<8x1xf32> -> vector<8x1xf32>
    %222 = vector.broadcast %221 : vector<8x1xf32> to vector<8x8xf32>
    %223 = arith.mulf %218, %222 : vector<8x8xf32>
    %cst_70 = arith.constant dense<0.000000e+00> : vector<8x16xf32>
    %224 = tpu.matmul %223, %210, %cst_70 {dimension_numbers = #tpu.dot_dimension_numbers<[1], [0], [0], [1], [0, 0, 1, 1], [], []>} : vector<8x8xf32>, vector<8x16xf32>, vector<8x16xf32> -> vector<8x16xf32>
    %225 = tpu.concatenate %207, %224 in 1 : vector<8x16xf32>, vector<8x16xf32> -> vector<8x32xf32>
    %226 = vector.extract_strided_slice %190 {offsets = [8, 0], sizes = [8, 16], strides = [1, 1]} : vector<16x96xf32> to vector<8x16xf32>
    %227 = vector.extract_strided_slice %190 {offsets = [8, 32], sizes = [8, 16], strides = [1, 1]} : vector<16x96xf32> to vector<8x16xf32>
    %228 = vector.extract_strided_slice %190 {offsets = [8, 64], sizes = [8, 16], strides = [1, 1]} : vector<16x96xf32> to vector<8x16xf32>
    %cst_71 = arith.constant dense<0.000000e+00> : vector<8x8xf32>
    %229 = tpu.matmul %226, %227, %cst_71 {dimension_numbers = #tpu.dot_dimension_numbers<[1], [1], [0], [0], [0, 0, 1, 0], [], []>} : vector<8x16xf32>, vector<8x16xf32>, vector<8x8xf32> -> vector<8x8xf32>
    %cst_72 = arith.constant 2.500000e-01 : f32
    %230 = vector.broadcast %cst_72 : f32 to vector<8x8xf32>
    %231 = arith.mulf %229, %230 : vector<8x8xf32>
    %cst_73 = arith.constant dense<0xFF800000> : vector<8xf32>
    %232 = vector.multi_reduction <maximumf>, %231, %cst_73 [1] : vector<8x8xf32> to vector<8xf32>
    %233 = vector.shape_cast %232 : vector<8xf32> to vector<8x1xf32>
    %234 = vector.broadcast %233 : vector<8x1xf32> to vector<8x8xf32>
    %235 = arith.subf %231, %234 : vector<8x8xf32>
    %236 = math.exp %235 : vector<8x8xf32>
    %cst_74 = arith.constant dense<0.000000e+00> : vector<8xf32>
    %237 = vector.multi_reduction <add>, %236, %cst_74 [1] : vector<8x8xf32> to vector<8xf32>
    %238 = vector.shape_cast %237 : vector<8xf32> to vector<8x1xf32>
    %239 = tpu.reciprocal %238 {approx = true} : vector<8x1xf32> -> vector<8x1xf32>
    %240 = vector.broadcast %239 : vector<8x1xf32> to vector<8x8xf32>
    %241 = arith.mulf %236, %240 : vector<8x8xf32>
    %cst_75 = arith.constant dense<0.000000e+00> : vector<8x16xf32>
    %242 = tpu.matmul %241, %228, %cst_75 {dimension_numbers = #tpu.dot_dimension_numbers<[1], [0], [0], [1], [0, 0, 1, 1], [], []>} : vector<8x8xf32>, vector<8x16xf32>, vector<8x16xf32> -> vector<8x16xf32>
    %243 = vector.extract_strided_slice %190 {offsets = [8, 16], sizes = [8, 16], strides = [1, 1]} : vector<16x96xf32> to vector<8x16xf32>
    %244 = vector.extract_strided_slice %190 {offsets = [8, 48], sizes = [8, 16], strides = [1, 1]} : vector<16x96xf32> to vector<8x16xf32>
    %245 = vector.extract_strided_slice %190 {offsets = [8, 80], sizes = [8, 16], strides = [1, 1]} : vector<16x96xf32> to vector<8x16xf32>
    %cst_76 = arith.constant dense<0.000000e+00> : vector<8x8xf32>
    %246 = tpu.matmul %243, %244, %cst_76 {dimension_numbers = #tpu.dot_dimension_numbers<[1], [1], [0], [0], [0, 0, 1, 0], [], []>} : vector<8x16xf32>, vector<8x16xf32>, vector<8x8xf32> -> vector<8x8xf32>
    %cst_77 = arith.constant 2.500000e-01 : f32
    %247 = vector.broadcast %cst_77 : f32 to vector<8x8xf32>
    %248 = arith.mulf %246, %247 : vector<8x8xf32>
    %cst_78 = arith.constant dense<0xFF800000> : vector<8xf32>
    %249 = vector.multi_reduction <maximumf>, %248, %cst_78 [1] : vector<8x8xf32> to vector<8xf32>
    %250 = vector.shape_cast %249 : vector<8xf32> to vector<8x1xf32>
    %251 = vector.broadcast %250 : vector<8x1xf32> to vector<8x8xf32>
    %252 = arith.subf %248, %251 : vector<8x8xf32>
    %253 = math.exp %252 : vector<8x8xf32>
    %cst_79 = arith.constant dense<0.000000e+00> : vector<8xf32>
    %254 = vector.multi_reduction <add>, %253, %cst_79 [1] : vector<8x8xf32> to vector<8xf32>
    %255 = vector.shape_cast %254 : vector<8xf32> to vector<8x1xf32>
    %256 = tpu.reciprocal %255 {approx = true} : vector<8x1xf32> -> vector<8x1xf32>
    %257 = vector.broadcast %256 : vector<8x1xf32> to vector<8x8xf32>
    %258 = arith.mulf %253, %257 : vector<8x8xf32>
    %cst_80 = arith.constant dense<0.000000e+00> : vector<8x16xf32>
    %259 = tpu.matmul %258, %245, %cst_80 {dimension_numbers = #tpu.dot_dimension_numbers<[1], [0], [0], [1], [0, 0, 1, 1], [], []>} : vector<8x8xf32>, vector<8x16xf32>, vector<8x16xf32> -> vector<8x16xf32>
    %260 = tpu.concatenate %242, %259 in 1 : vector<8x16xf32>, vector<8x16xf32> -> vector<8x32xf32>
    %261 = tpu.concatenate %225, %260 in 0 : vector<8x32xf32>, vector<8x32xf32> -> vector<16x32xf32>
    %c352 = arith.constant 352 : index
    %c0_81 = arith.constant 0 : index
    %262 = vector.load %arg2[%c352, %c0_81] : memref<560x128xf32, #tpu.memory_space<vmem>>, vector<32x32xf32>
    %cst_82 = arith.constant dense<0.000000e+00> : vector<16x32xf32>
    %263 = tpu.matmul %261, %262, %cst_82 {dimension_numbers = #tpu.dot_dimension_numbers<[1], [0], [0], [1], [0, 0, 1, 1], [], []>} : vector<16x32xf32>, vector<32x32xf32>, vector<16x32xf32> -> vector<16x32xf32>
    %c384 = arith.constant 384 : index
    %c0_83 = arith.constant 0 : index
    %264 = vector.load %arg2[%c384, %c0_83] : memref<560x128xf32, #tpu.memory_space<vmem>>, vector<1x32xf32>
    %265 = vector.broadcast %264 : vector<1x32xf32> to vector<16x32xf32>
    %266 = arith.addf %263, %265 : vector<16x32xf32>
    %267 = arith.addf %266, %185 : vector<16x32xf32>
    %c392 = arith.constant 392 : index
    %c0_84 = arith.constant 0 : index
    %268 = vector.load %arg2[%c392, %c0_84] : memref<560x128xf32, #tpu.memory_space<vmem>>, vector<2x32xf32>
    %269 = vector.extract_strided_slice %268 {offsets = [0, 0], sizes = [1, 32], strides = [1, 1]} : vector<2x32xf32> to vector<1x32xf32>
    %270 = vector.extract_strided_slice %268 {offsets = [1, 0], sizes = [1, 32], strides = [1, 1]} : vector<2x32xf32> to vector<1x32xf32>
    %cst_85 = arith.constant dense<0.000000e+00> : vector<16xf32>
    %271 = vector.multi_reduction <add>, %267, %cst_85 [1] : vector<16x32xf32> to vector<16xf32>
    %272 = vector.shape_cast %271 : vector<16xf32> to vector<16x1xf32>
    %cst_86 = arith.constant 3.200000e+01 : f32
    %273 = vector.broadcast %cst_86 : f32 to vector<16x1xf32>
    %274 = arith.divf %272, %273 : vector<16x1xf32>
    %275 = vector.broadcast %274 : vector<16x1xf32> to vector<16x32xf32>
    %276 = arith.subf %267, %275 : vector<16x32xf32>
    %277 = arith.mulf %276, %276 : vector<16x32xf32>
    %cst_87 = arith.constant dense<0.000000e+00> : vector<16xf32>
    %278 = vector.multi_reduction <add>, %277, %cst_87 [1] : vector<16x32xf32> to vector<16xf32>
    %279 = vector.shape_cast %278 : vector<16xf32> to vector<16x1xf32>
    %cst_88 = arith.constant 3.200000e+01 : f32
    %280 = vector.broadcast %cst_88 : f32 to vector<16x1xf32>
    %281 = arith.divf %279, %280 : vector<16x1xf32>
    %cst_89 = arith.constant 9.99999996E-13 : f32
    %282 = vector.broadcast %cst_89 : f32 to vector<16x1xf32>
    %283 = arith.addf %281, %282 : vector<16x1xf32>
    %284 = math.rsqrt %283 : vector<16x1xf32>
    %285 = vector.broadcast %284 : vector<16x1xf32> to vector<16x32xf32>
    %286 = arith.mulf %276, %285 : vector<16x32xf32>
    %287 = vector.broadcast %269 : vector<1x32xf32> to vector<16x32xf32>
    %288 = arith.mulf %286, %287 : vector<16x32xf32>
    %289 = vector.broadcast %270 : vector<1x32xf32> to vector<16x32xf32>
    %290 = arith.addf %288, %289 : vector<16x32xf32>
    %c400 = arith.constant 400 : index
    %c0_90 = arith.constant 0 : index
    %291 = vector.load %arg2[%c400, %c0_90] : memref<560x128xf32, #tpu.memory_space<vmem>>, vector<32x64xf32>
    %cst_91 = arith.constant dense<0.000000e+00> : vector<16x64xf32>
    %292 = tpu.matmul %290, %291, %cst_91 {dimension_numbers = #tpu.dot_dimension_numbers<[1], [0], [0], [1], [0, 0, 1, 1], [], []>} : vector<16x32xf32>, vector<32x64xf32>, vector<16x64xf32> -> vector<16x64xf32>
    %c432 = arith.constant 432 : index
    %c0_92 = arith.constant 0 : index
    %293 = vector.load %arg2[%c432, %c0_92] : memref<560x128xf32, #tpu.memory_space<vmem>>, vector<1x64xf32>
    %294 = vector.broadcast %293 : vector<1x64xf32> to vector<16x64xf32>
    %295 = arith.addf %292, %294 : vector<16x64xf32>
    %cst_93 = arith.constant 5.000000e-01 : f32
    %296 = vector.broadcast %cst_93 : f32 to vector<16x64xf32>
    %297 = arith.mulf %296, %295 : vector<16x64xf32>
    %cst_94 = arith.constant 4.471500e-02 : f32
    %298 = vector.broadcast %cst_94 : f32 to vector<16x64xf32>
    %299 = arith.mulf %298, %295 : vector<16x64xf32>
    %300 = arith.mulf %299, %295 : vector<16x64xf32>
    %301 = arith.mulf %300, %295 : vector<16x64xf32>
    %302 = arith.addf %295, %301 : vector<16x64xf32>
    %cst_95 = arith.constant 0.797884583 : f32
    %303 = vector.broadcast %cst_95 : f32 to vector<16x64xf32>
    %304 = arith.mulf %303, %302 : vector<16x64xf32>
    %305 = math.tanh %304 : vector<16x64xf32>
    %cst_96 = arith.constant 1.000000e+00 : f32
    %306 = vector.broadcast %cst_96 : f32 to vector<16x64xf32>
    %307 = arith.addf %306, %305 : vector<16x64xf32>
    %308 = arith.mulf %297, %307 : vector<16x64xf32>
    %c440 = arith.constant 440 : index
    %c0_97 = arith.constant 0 : index
    %309 = vector.load %arg2[%c440, %c0_97] : memref<560x128xf32, #tpu.memory_space<vmem>>, vector<64x32xf32>
    %cst_98 = arith.constant dense<0.000000e+00> : vector<16x32xf32>
    %310 = tpu.matmul %308, %309, %cst_98 {dimension_numbers = #tpu.dot_dimension_numbers<[1], [0], [0], [1], [0, 0, 1, 1], [], []>} : vector<16x64xf32>, vector<64x32xf32>, vector<16x32xf32> -> vector<16x32xf32>
    %c504 = arith.constant 504 : index
    %c0_99 = arith.constant 0 : index
    %311 = vector.load %arg2[%c504, %c0_99] : memref<560x128xf32, #tpu.memory_space<vmem>>, vector<1x32xf32>
    %312 = vector.broadcast %311 : vector<1x32xf32> to vector<16x32xf32>
    %313 = arith.addf %310, %312 : vector<16x32xf32>
    %314 = arith.addf %313, %290 : vector<16x32xf32>
    %c512 = arith.constant 512 : index
    %c0_100 = arith.constant 0 : index
    %315 = vector.load %arg2[%c512, %c0_100] : memref<560x128xf32, #tpu.memory_space<vmem>>, vector<2x32xf32>
    %316 = vector.extract_strided_slice %315 {offsets = [0, 0], sizes = [1, 32], strides = [1, 1]} : vector<2x32xf32> to vector<1x32xf32>
    %317 = vector.extract_strided_slice %315 {offsets = [1, 0], sizes = [1, 32], strides = [1, 1]} : vector<2x32xf32> to vector<1x32xf32>
    %cst_101 = arith.constant dense<0.000000e+00> : vector<16xf32>
    %318 = vector.multi_reduction <add>, %314, %cst_101 [1] : vector<16x32xf32> to vector<16xf32>
    %319 = vector.shape_cast %318 : vector<16xf32> to vector<16x1xf32>
    %cst_102 = arith.constant 3.200000e+01 : f32
    %320 = vector.broadcast %cst_102 : f32 to vector<16x1xf32>
    %321 = arith.divf %319, %320 : vector<16x1xf32>
    %322 = vector.broadcast %321 : vector<16x1xf32> to vector<16x32xf32>
    %323 = arith.subf %314, %322 : vector<16x32xf32>
    %324 = arith.mulf %323, %323 : vector<16x32xf32>
    %cst_103 = arith.constant dense<0.000000e+00> : vector<16xf32>
    %325 = vector.multi_reduction <add>, %324, %cst_103 [1] : vector<16x32xf32> to vector<16xf32>
    %326 = vector.shape_cast %325 : vector<16xf32> to vector<16x1xf32>
    %cst_104 = arith.constant 3.200000e+01 : f32
    %327 = vector.broadcast %cst_104 : f32 to vector<16x1xf32>
    %328 = arith.divf %326, %327 : vector<16x1xf32>
    %cst_105 = arith.constant 9.99999996E-13 : f32
    %329 = vector.broadcast %cst_105 : f32 to vector<16x1xf32>
    %330 = arith.addf %328, %329 : vector<16x1xf32>
    %331 = math.rsqrt %330 : vector<16x1xf32>
    %332 = vector.broadcast %331 : vector<16x1xf32> to vector<16x32xf32>
    %333 = arith.mulf %323, %332 : vector<16x32xf32>
    %334 = vector.broadcast %316 : vector<1x32xf32> to vector<16x32xf32>
    %335 = arith.mulf %333, %334 : vector<16x32xf32>
    %336 = vector.broadcast %317 : vector<1x32xf32> to vector<16x32xf32>
    %337 = arith.addf %335, %336 : vector<16x32xf32>
    %c520 = arith.constant 520 : index
    %c0_106 = arith.constant 0 : index
    %338 = vector.load %arg2[%c520, %c0_106] : memref<560x128xf32, #tpu.memory_space<vmem>>, vector<32x128xf32>
    %cst_107 = arith.constant dense<0.000000e+00> : vector<16x128xf32>
    %339 = tpu.matmul %337, %338, %cst_107 {dimension_numbers = #tpu.dot_dimension_numbers<[1], [0], [0], [1], [0, 0, 1, 1], [], []>} : vector<16x32xf32>, vector<32x128xf32>, vector<16x128xf32> -> vector<16x128xf32>
    %c552 = arith.constant 552 : index
    %c0_108 = arith.constant 0 : index
    %340 = vector.load %arg2[%c552, %c0_108] : memref<560x128xf32, #tpu.memory_space<vmem>>, vector<1x128xf32>
    %341 = vector.broadcast %340 : vector<1x128xf32> to vector<16x128xf32>
    %342 = arith.addf %339, %341 : vector<16x128xf32>
    %cst_109 = arith.constant dense<0xFF800000> : vector<16xf32>
    %343 = vector.multi_reduction <maximumf>, %342, %cst_109 [1] : vector<16x128xf32> to vector<16xf32>
    %344 = vector.shape_cast %343 : vector<16xf32> to vector<16x1xf32>
    %345 = vector.broadcast %344 : vector<16x1xf32> to vector<16x128xf32>
    %346 = arith.subf %342, %345 : vector<16x128xf32>
    %347 = math.exp %346 : vector<16x128xf32>
    %cst_110 = arith.constant dense<0.000000e+00> : vector<16xf32>
    %348 = vector.multi_reduction <add>, %347, %cst_110 [1] : vector<16x128xf32> to vector<16xf32>
    %349 = vector.shape_cast %348 : vector<16xf32> to vector<16x1xf32>
    %350 = vector.broadcast %349 : vector<16x1xf32> to vector<16x128xf32>
    %351 = arith.divf %347, %350 : vector<16x128xf32>
    %c0_111 = arith.constant 0 : index
    %c0_112 = arith.constant 0 : index
    %352 = vector.load %arg3[%c0_111, %c0_112] : memref<16x128xf32, #tpu.memory_space<vmem>>, vector<16x128xf32>
    tpu.vector_store %arg3[%c0_111, %c0_112], %351 {strides = array<i32>} : memref<16x128xf32, #tpu.memory_space<vmem>>, vector<16x128xf32>,
    return
  }
  func.func @transform_0(%arg0: i32) -> (i32, i32) {
    %c0_i32 = arith.constant 0 : i32
    %c0_i32_0 = arith.constant 0 : i32
    return %arg0, %c0_i32 : i32, i32
  }
  func.func @transform_1(%arg0: i32) -> (i32, i32) {
    %c0_i32 = arith.constant 0 : i32
    %c0_i32_0 = arith.constant 0 : i32
    %c0_i32_1 = arith.constant 0 : i32
    return %c0_i32, %c0_i32_0 : i32, i32
  }
  func.func @transform_2(%arg0: i32) -> (i32, i32) {
    %c0_i32 = arith.constant 0 : i32
    %c0_i32_0 = arith.constant 0 : i32
    return %arg0, %c0_i32 : i32, i32
  }
}

</mosaic_0001>

<bundles_post_ra>
// kernel: _lambda_.1
= control target key start
LH: loop header
LB: loop body
LE: loop exit
PB: predicated region body
PF: predicated region fallthrough
CT: control target
= control target key end

     0   :  { %7 = vsyncpa [#allocation3], 0  ;;  %s1759_s0 = inlined_call_operand.vmem [shape: s32[16,1], index: 0, kind: input, shape index: {}]   ;;  %s1760_s1 = inlined_call_operand.hbm [shape: f32[560,128], index: 1, kind: input, shape index: {}]   ;;  %s1761_s2 = inlined_call_operand.hbm [shape: f32[16,128], index: 2, kind: output, shape index: {}]  }
   0x1   :  { %8 = vsyncpa [#allocation4], 0  ;;  %s15_s11 = sshll.u32 %s1760_s1, 4  ;;  %s1515_s12 = smov [#allocation2]   ;;  %s16_s11 = int_to_ptr.hbm [resolvable:$true] %s15_s11 }
   0x2   :  { %s17_s13 = sshll.u32 %s1515_s12, 4  ;;  %s1516_s14 = smov 128   ;;  %s18_s13 = int_to_ptr.vmem [resolvable:$true] %s17_s13 }
   0x3   :  { %s1517_s15 = smov 8  }
   0x4   :  { %23 = dma.hbm_to_vmem [thread:$0]  %s16_s11, 8960, %s18_s13, [#allocation3], %s1516_s14, %s1516_s14, %s1517_s15  }
   0x5   :  { %1511 = dma.done.wait [#allocation3], 8960  }
   0x6   :  { %1512 = vsyncadd [#allocation3], 4294958336  ;;  %v1518_v0 = vmov 0   ;;  %v28_v1 = vld [vmem:[%s1759_s0] sm:$0xff]  ;;  %v52_v2 = vld [vmem:[#allocation2 + $0x38] sm:$0xff]  ;;  %v30_v11 = vlaneseq  ;;  %vm53_vm0 = vcmask 523264  }
   0x7   :  { %1383 = vset.pattern.permute.xlu0 %v1518_v0  ;;  %68 = vmatpush.msra.mxu0 %v52_v2  ;;  %v51_v3 = vld [vmem:[#allocation2 + $0x30] sm:$0xff]  ;;  %v50_v4 = vld [vmem:[#allocation2 + $0x28] sm:$0xff]  ;;  %v49_v5 = vld [vmem:[#allocation2 + $0x20] sm:$0xff]  ;;  %v1519_v14 = vmov 0.0   ;;  %vm84_vm3 = vcmask 261120   ;;  %v1520_v25 = vmov 32.0  }
   0x8   :  { %33 = vperm.xlu0 %1383, %v28_v1   ;;  %v29_v6 = vld [vmem:[%s1759_s0 + $0x8] sm:$0xff]  ;;  %v48_v7 = vld [vmem:[#allocation2 + $0x18] sm:$0xff]  ;;  %v47_v8 = vld [vmem:[#allocation2 + $0x10] sm:$0xff]  ;;  %v31_v12 = vand.u32 127, %v30_v11  ;;  %1393 = vrcp.f32 %v1520_v25  ;;  %s1521_s0 = smov 112   ;;  %s1522_s19 = smov 80  }
   0x9   :  { %69 = vmatpush.msra.mxu0 %v51_v3  ;;  %v46_v9 = vld [vmem:[#allocation2 + $0x8] sm:$0xff]  ;;  %v45_v10 = vld [vmem:[#allocation2] sm:$0xff]  ;;  %v144_v43 = vld [vmem:[#allocation2 + $0x78] sm:$0xff]  ;;  %s1523_s20 = smov 96   ;;  %vm180_vm11 = vcmask 130048   ;;  %vm206_vm12 = vcmask 64512  }
   0xa   :  { %v44_v18 = vld [vmem:[#allocation2 + $0x40] sm:$0xff]  ;;  %v143_v44 = vld [vmem:[#allocation2 + $0x70] sm:$0xff]  ;;  %v142_v45 = vld [vmem:[#allocation2 + $0x68] sm:$0xff]  ;;  %s1524_s21 = smov 48   ;;  %s1525_s22 = smov 64  }
   0xb   :  { %70 = vmatpush.msra.mxu0 %v50_v4  ;;  %v145_v42 = vld [vmem:[#allocation2 + $0x80] sm:$0xff]  ;;  %v1384_v11 = vld [vmem:[#allocation2 + $0x88] ss:$0 sm:$0xff]  ;;  %s1526_s23 = smov 16   ;;  %s1527_s24 = smov [#allocation5]  }
   0xc   :  { %166 = vmatpush.msra.mxu1 %v145_v42  ;;  %v83_v57 = vld [vmem:[#allocation2 + $0x60] sm:$0x3]  ;;  %s1309_s25 = sshll.u32 %s1527_s24, 4  ;;  %s1311_s28 = sshll.u32 %s1761_s2, 4  ;;  %s1310_s25 = int_to_ptr.vmem [resolvable:$true] %s1309_s25  ;;  %s1312_s28 = int_to_ptr.hbm [resolvable:$true] %s1311_s28 }
   0xd   :  { %71 = vmatpush.msra.mxu0 %v49_v5  ;;  %v136_v61 = vperm.slane %v83_v57, 0  ;;  %v139_v1 = vperm.slane %v83_v57, 1 }
   0xe   :  { %v1394_v26 = vpop.eup %1393  ;;  %167 = vmatpush.msra.mxu1 %v144_v43 }
   0xf   :  { %72 = vmatpush.msra.mxu0 %v48_v7  ;;  %v92_v27 = vmul.f32 32.0, %v1394_v26  ;;  %vm96_vm4 = vweird.f32 %v1394_v26 }
  0x10   :  { %36 = vperm.xlu0 %1383, %v29_v6   ;;  %168 = vmatpush.msra.mxu1 %v143_v44 }
  0x11   :  { %73 = vmatpush.msra.mxu0 %v47_v8  ;;  %v93_v28 = vsub.f32 1.0, %v92_v27 }
  0x12   :  { %169 = vmatpush.msra.mxu1 %v142_v45 }
  0x13   :  { %74 = vmatpush.msra.mxu0 %v46_v9  ;;  %v94_v29 = vmul.f32 %v1394_v26, %v93_v28 }
  0x15   :  { %75 = vmatpush.msra.mxu0 %v45_v10  ;;  %v95_v30 = vadd.f32 %v1394_v26, %v94_v29 }
  0x17   :  { %v1559_v31 = vsel %vm96_vm4, %v1394_v26, %v95_v30 }
  0x7a   :  { %v34_v13 = vpop.permute.xlu0 %33 }
  0x7b   :  { %vm38_vm1 = vcmp.eq.s32.totalorder %v31_v12, %v34_v13 }
  0x7c   :  { %v1324_v15 = vsel %vm38_vm1, 1.0, %v1519_v14 }
  0x7d   :  { %1326 = vmatmul.msk.f32.vlgmr.msra.gmra.mxu0 %vm53_vm0, %v1324_v15 }
  0x82   :  { %v37_v16 = vpop.permute.xlu0 %36 }
  0x83   :  { %vm39_vm2 = vcmp.eq.s32.totalorder %v31_v12, %v37_v16 }
  0x84   :  { %v1325_v17 = vsel %vm39_vm2, 1.0, %v1519_v14 }
  0x85   :  { %1327 = vmatmul.msk.f32.gmra.mxu0 %vm53_vm0, %v1325_v17 }
  0xfa   :  { %v77_v19 = vpop.f32.mrf.mxu0 }
  0xfb   :  { %v78_v20 = vadd.f32 %v77_v19, %v44_v18 }
  0xfd   :  { %v85_v21 = vsel %vm84_vm3, %v78_v20, 0.0 }
  0xfe   :  { %86 = vadd.xlane.f32.xlu1 %v85_v21 }
 0x102   :  { %v80_v22 = vpop.f32.mrf.mxu0 }
 0x103   :  { %v81_v23 = vadd.f32 %v80_v22, %v44_v18 }
 0x105   :  { %v88_v24 = vsel %vm84_vm3, %v81_v23, 0.0 }
 0x106   :  { %89 = vadd.xlane.f32.xlu2 %v88_v24 }
 0x171   :  { %v87_v32 = vpop.xlane.xlu1 %86 }
 0x172   :  { %v98_v33 = vmul.f32 %v1559_v31, %v87_v32 }
 0x174   :  { %v100_v34 = vsub.f32 %v78_v20, %v98_v33 }
 0x176   :  { %v102_v35 = vmul.f32 %v100_v34, %v100_v34 }
 0x178   :  { %v104_v36 = vsel %vm84_vm3, %v102_v35, 0.0 }
 0x179   :  { %105 = vadd.xlane.f32.xlu1 %v104_v36  ;;  %v90_v37 = vpop.xlane.xlu2 %89 }
 0x17a   :  { %v99_v38 = vmul.f32 %v1559_v31, %v90_v37 }
 0x17c   :  { %v101_v39 = vsub.f32 %v81_v23, %v99_v38 }
 0x17e   :  { %v103_v40 = vmul.f32 %v101_v39, %v101_v39 }
 0x180   :  { %v107_v41 = vsel %vm84_vm3, %v103_v40, 0.0 }
 0x181   :  { %108 = vadd.xlane.f32.xlu2 %v107_v41 }
 0x1ec   :  { %v106_v46 = vpop.xlane.xlu1 %105 }
 0x1ed   :  { %v110_v47 = vmul.f32 %v106_v46, %v1559_v31 }
 0x1ef   :  { %v112_v48 = vadd.f32 1e-12, %v110_v47 }
 0x1f1   :  { %1395 = vrsqrt.f32 %v112_v48  ;;  %vm120_vm6 = vweird.f32 %v112_v48 }
 0x1f4   :  { %v109_v49 = vpop.xlane.xlu2 %108 }
 0x1f5   :  { %v111_v50 = vmul.f32 %v109_v49, %v1559_v31 }
 0x1f7   :  { %v1396_v51 = vpop.eup %1395  ;;  %v113_v52 = vadd.f32 1e-12, %v111_v50 }
 0x1f8   :  { %v115_v53 = vmul.f32 %v1396_v51, %v112_v48  ;;  %vm121_vm5 = vweird.f32 %v1396_v51 }
 0x1f9   :  { %1397 = vrsqrt.f32 %v113_v52  ;;  %vm122_vm7 = vmor %vm120_vm6, %vm121_vm5  ;;  %vm130_vm9 = vweird.f32 %v113_v52 }
 0x1fa   :  { %v116_v54 = vmul.f32 %v1396_v51, %v115_v53 }
 0x1fc   :  { %v117_v55 = vmul.f32 0.5, %v116_v54 }
 0x1fe   :  { %v118_v56 = vsub.f32 1.5, %v117_v55 }
 0x1ff   :  { %v1398_v58 = vpop.eup %1397 }
 0x200   :  { %v119_v59 = vmul.f32 %v1396_v51, %v118_v56  ;;  %v125_v60 = vmul.f32 %v1398_v58, %v113_v52  ;;  %vm131_vm8 = vweird.f32 %v1398_v58 }
 0x201   :  { %vm132_vm10 = vmor %vm130_vm9, %vm131_vm8 }
 0x202   :  { %v123_v62 = vsel %vm122_vm7, %v1396_v51, %v119_v59  ;;  %v126_v63 = vmul.f32 %v1398_v58, %v125_v60 }
 0x203   :  { %v134_v0 = vmul.f32 %v123_v62, %v100_v34 }
 0x204   :  { %v127_v2 = vmul.f32 0.5, %v126_v63 }
 0x205   :  { %v137_v3 = vmul.f32 %v136_v61, %v134_v0 }
 0x206   :  { %v128_v4 = vsub.f32 1.5, %v127_v2 }
 0x207   :  { %v1567_v5 = vadd.f32 %v139_v1, %v137_v3  ;;  %v454_v3 = vld [vmem:[#allocation2 + $0xa8] sm:$0xff] }
 0x208   :  { %v129_v6 = vmul.f32 %v1398_v58, %v128_v4  ;;  %v453_v4 = vld [vmem:[#allocation2 + $0xa0] sm:$0xff] }
 0x209   :  { %1328 = vmatmul.msk.f32.vlgmr.msra.gmra.mxu1 %vm84_vm3, %v1567_v5 }
 0x20a   :  { %v133_v7 = vsel %vm132_vm10, %v1398_v58, %v129_v6  ;;  %v452_v6 = vld [vmem:[#allocation2 + $0x98] sm:$0xff] }
 0x20b   :  { %v135_v8 = vmul.f32 %v133_v7, %v101_v39 }
 0x20d   :  { %v138_v9 = vmul.f32 %v136_v61, %v135_v8 }
 0x20f   :  { %v1571_v10 = vadd.f32 %v139_v1, %v138_v9  ;;  %v451_v9 = vld [vmem:[#allocation2 + $0x90] sm:$0xff] }
 0x211   :  { %1329 = vmatmul.msk.f32.gmra.mxu1 %vm84_vm3, %v1571_v10 }
 0x286   :  { %v171_v12 = vpop.f32.mrf.mxu1 }
 0x287   :  { %v1575_v13 = vadd.f32 %v1384_v11, %v171_v12 }
 0x289   :  { %244 = vrot.lane.b32.xlu1 %v1575_v13, %s1521_s0  ;;  %246 = vrot.lane.b32.xlu0 %v1575_v13, %s1522_s19 }
 0x28a   :  { %178 = vrot.lane.b32.xlu2 %v1575_v13, %s1523_s20 }
 0x28e   :  { %v174_v14 = vpop.f32.mrf.mxu1 }
 0x28f   :  { %v1583_v15 = vadd.f32 %v1384_v11, %v174_v14 }
 0x291   :  { %380 = vrot.lane.b32.xlu1 %v1583_v15, %s1521_s0  ;;  %316 = vrot.lane.b32.xlu0 %v1583_v15, %s1523_s20 }
 0x292   :  { %382 = vrot.lane.b32.xlu2 %v1583_v15, %s1522_s19 }
 0x2e4   :  { %v179_v16 = vpop.permute.xlu2 %178 }
 0x2e5   :  { %1330 = vmatpush.xpose.msk.msra.mxu2 %vm180_vm11, %v179_v16 }
 0x2e8   :  { %1331 = vmatmul.msk.f32.vlgmr.msra.gmra.mxu2 %vm180_vm11, %v1575_v13 }
 0x2ec   :  { %v383_v17 = vpop.permute.xlu2 %382 }
 0x2ed   :  { %1339 = vmatpush.xpose.msk.msrb.mxu1 %vm180_vm11, %v383_v17 }
 0x2fb   :  { %v245_v18 = vpop.permute.xlu1 %244  ;;  %v247_v19 = vpop.permute.xlu0 %246 }
 0x2fc   :  { %1333 = vmatpush.xpose.msk.msra.mxu3 %vm180_vm11, %v247_v19 }
 0x2ff   :  { %1334 = vmatmul.msk.f32.vlgmr.msra.gmra.mxu3 %vm180_vm11, %v245_v18  ;;  %v1385_v18 = vld [vmem:[#allocation2 + $0xb0] ss:$0 sm:$0xff] }
 0x303   :  { %v381_v20 = vpop.permute.xlu1 %380  ;;  %v317_v21 = vpop.permute.xlu0 %316 }
 0x304   :  { %1336 = vmatpush.xpose.msk.msrb.mxu3 %vm180_vm11, %v317_v21  ;;  %1340 = vmatmul.msk.f32.vlgmr.msrb.gmra.mxu1 %vm180_vm11, %v381_v20 }
 0x307   :  { %1337 = vmatmul.msk.f32.vlgmr.msrb.gmra.mxu3 %vm180_vm11, %v1583_v15 }
 0x36b   :  { %v202_v22 = vpop.f32.mrf.mxu2 }
 0x36c   :  { %v205_v23 = vmul.f32 0.25, %v202_v22 }
 0x36e   :  { %v207_v24 = vsel %vm206_vm12, %v205_v23, -inf }
 0x36f   :  { %208 = vmax.xlane.f32.xlu2 %v207_v24 }
 0x381   :  { %v405_v37 = vpop.f32.mrf.mxu1 }
 0x382   :  { %v269_v25 = vpop.f32.mrf.mxu3  ;;  %v408_v38 = vmul.f32 0.25, %v405_v37 }
 0x383   :  { %v272_v26 = vmul.f32 0.25, %v269_v25 }
 0x384   :  { %v409_v39 = vsel %vm206_vm12, %v408_v38, -inf }
 0x385   :  { %v273_v27 = vsel %vm206_vm12, %v272_v26, -inf }
 0x386   :  { %274 = vmax.xlane.f32.xlu0 %v273_v27 }
 0x38a   :  { %v339_v28 = vpop.f32.mrf.mxu3 }
 0x38b   :  { %v342_v29 = vmul.f32 0.25, %v339_v28 }
 0x38d   :  { %v343_v30 = vsel %vm206_vm12, %v342_v29, -inf }
 0x39a   :  { %284 = vrot.lane.b32.xlu0 %v1575_v13, %s1524_s21 }
 0x3c4   :  { %344 = vmax.xlane.f32.xlu0 %v343_v30 }
 0x3d8   :  { %420 = vrot.lane.b32.xlu0 %v1583_v15, %s1524_s21 }
 0x3e2   :  { %v209_v32 = vpop.xlane.xlu2 %208 }
 0x3e3   :  { %v210_v33 = vsub.f32 %v205_v23, %v209_v32  ;;  %v541_v32 = vld [vmem:[#allocation2 + $0xd0] sm:$0xff] }
 0x3e5   :  { %v211_v34 = vmul.f32 1.442695, %v210_v33  ;;  %v540_v33 = vld [vmem:[#allocation2 + $0xc8] sm:$0xff] }
 0x3e7   :  { %1399 = vpow2.f32 %v211_v34  ;;  %v539_v34 = vld [vmem:[#allocation2 + $0xc0] sm:$0xff] }
 0x3ed   :  { %v1400_v35 = vpop.eup %1399 }
 0x3ee   :  { %v213_v36 = vsel %vm206_vm12, %v1400_v35, 0.0 }
 0x3ef   :  { %214 = vadd.xlane.f32.xlu2 %v213_v36 }
 0x3f7   :  { %410 = vmax.xlane.f32.xlu2 %v409_v39 }
 0x3f9   :  { %v275_v40 = vpop.xlane.xlu0 %274 }
 0x3fa   :  { %v276_v41 = vsub.f32 %v272_v26, %v275_v40 }
 0x3fc   :  { %v277_v42 = vmul.f32 1.442695, %v276_v41 }
 0x3fe   :  { %1401 = vpow2.f32 %v277_v42  ;;  %v1632_v42 = vld [vmem:[#allocation2 + $0xb8] sm:$0x3] }
 0x404   :  { %v1402_v43 = vpop.eup %1401 }
 0x405   :  { %v279_v44 = vsel %vm206_vm12, %v1402_v43, 0.0 }
 0x406   :  { %280 = vadd.xlane.f32.xlu1 %v279_v44 }
 0x40c   :  { %v285_v45 = vpop.permute.xlu0 %284 }
 0x40d   :  { %305 = vmatpush.msrb.mxu2 %v285_v45  ;;  %v533_v45 = vperm.slane %v1632_v42, 0 }
 0x41f   :  { %218 = vrot.lane.b32.xlu1 %v1575_v13, %s1525_s22 }
 0x437   :  { %v345_v46 = vpop.xlane.xlu0 %344 }
 0x438   :  { %v346_v47 = vsub.f32 %v342_v29, %v345_v46 }
 0x43a   :  { %v347_v48 = vmul.f32 1.442695, %v346_v47 }
 0x43c   :  { %1403 = vpow2.f32 %v347_v48  ;;  %v536_v48 = vperm.slane %v1632_v42, 1 }
 0x442   :  { %v1404_v49 = vpop.eup %1403 }
 0x443   :  { %v349_v50 = vsel %vm206_vm12, %v1404_v49, 0.0 }
 0x444   :  { %350 = vadd.xlane.f32.xlu2 %v349_v50 }
 0x44a   :  { %v421_v51 = vpop.permute.xlu0 %420 }
 0x44b   :  { %441 = vmatpush.msra.mxu3 %v421_v51 }
 0x45c   :  { %354 = vrot.lane.b32.xlu2 %v1583_v15, %s1525_s22 }
 0x462   :  { %v215_v55 = vpop.xlane.xlu2 %214 }
 0x46a   :  { %v411_v59 = vpop.xlane.xlu2 %410 }
 0x46b   :  { %v412_v1 = vsub.f32 %v408_v38, %v411_v59  ;;  %v595_v59 = vld [vmem:[#allocation2 + $0x100] sm:$0xff] }
 0x46d   :  { %v413_v2 = vmul.f32 1.442695, %v412_v1 }
 0x479   :  { %v281_v52 = vpop.xlane.xlu1 %280 }
 0x47a   :  { %1405 = vrcp.f32 %v281_v52 }
 0x47b   :  { %1407 = vrcp.f32 %v215_v55  ;;  %v599_v55 = vld [vmem:[#allocation2 + $0x120] sm:$0xff] }
 0x47c   :  { %616 = vmatpush.msra.mxu1 %v599_v55 }
 0x480   :  { %v1406_v53 = vpop.eup %1405 }
 0x481   :  { %v283_v54 = vmul.f32 %v1406_v53, %v1402_v43  ;;  %v1408_v56 = vpop.eup %1407 }
 0x482   :  { %v217_v58 = vmul.f32 %v1408_v56, %v1400_v35  ;;  %v598_v56 = vld [vmem:[#allocation2 + $0x118] sm:$0xff] }
 0x483   :  { %1335 = vmatmul.msk.f32.vlgmr.msrb.gmra.mxu2 %vm206_vm12, %v283_v54  ;;  %617 = vmatpush.msra.mxu1 %v598_v56 }
 0x491   :  { %v219_v57 = vpop.permute.xlu1 %218 }
 0x492   :  { %239 = vmatpush.msrb.mxu0 %v219_v57  ;;  %v597_v57 = vld [vmem:[#allocation2 + $0x110] sm:$0xff] }
 0x493   :  { %1332 = vmatmul.msk.f32.vlgmr.msrb.gmra.mxu0 %vm206_vm12, %v217_v58  ;;  %v596_v58 = vld [vmem:[#allocation2 + $0x108] sm:$0xff]  ;;  %618 = vmatpush.msra.mxu1 %v597_v57 }
 0x495   :  { %619 = vmatpush.msra.mxu1 %v596_v58 }
 0x497   :  { %620 = vmatpush.msra.mxu1 %v595_v59 }
 0x4b7   :  { %v351_v60 = vpop.xlane.xlu2 %350 }
 0x4b8   :  { %1409 = vrcp.f32 %v351_v60  ;;  %v594_v60 = vld [vmem:[#allocation2 + $0xf8] sm:$0xff] }
 0x4b9   :  { %1411 = vpow2.f32 %v413_v2  ;;  %621 = vmatpush.msra.mxu1 %v594_v60 }
 0x4be   :  { %v1410_v61 = vpop.eup %1409 }
 0x4bf   :  { %v353_v62 = vmul.f32 %v1410_v61, %v1404_v49  ;;  %v355_v63 = vpop.permute.xlu2 %354  ;;  %v1412_v7 = vpop.eup %1411  ;;  %v593_v61 = vld [vmem:[#allocation2 + $0xf0] sm:$0xff] }
 0x4c0   :  { %375 = vmatpush.msra.mxu2 %v355_v63  ;;  %v415_v8 = vsel %vm206_vm12, %v1412_v7, 0.0  ;;  %622 = vmatpush.msra.mxu1 %v593_v61 }
 0x4c1   :  { %1338 = vmatmul.msk.f32.vlgmr.msra.gmra.mxu2 %vm206_vm12, %v353_v62  ;;  %v592_v62 = vld [vmem:[#allocation2 + $0xe8] sm:$0xff] }
 0x4c2   :  { %475 = vmatpush.msrb.mxu2 %v454_v3  ;;  %623 = vmatpush.msra.mxu1 %v592_v62  ;;  %v633_v62 = vld [vmem:[#allocation2 + $0x130] sm:$0x3] }
 0x4c4   :  { %476 = vmatpush.msrb.mxu2 %v453_v4 }
 0x4c6   :  { %477 = vmatpush.msrb.mxu2 %v452_v6 }
 0x4c8   :  { %478 = vmatpush.msrb.mxu2 %v451_v9 }
 0x506   :  { %v307_v0 = vpop.f32.mrf.mxu2 }
 0x507   :  { %311 = vrot.lane.b32.xlu1 %v307_v0, %s1526_s23 }
 0x510   :  { %v241_v11 = vpop.f32.mrf.mxu0 }
 0x531   :  { %416 = vadd.xlane.f32.xlu1 %v415_v8 }
 0x544   :  { %v377_v17 = vpop.f32.mrf.mxu2 }
 0x579   :  { %v312_v12 = vpop.permute.xlu1 %311 }
 0x57a   :  { %v314_v13 = vsel %vm180_vm11, %v241_v11, %v312_v12 }
 0x57b   :  { %1342 = vmatmul.msk.f32.vlgmr.msrb.gmra.mxu2 %vm84_vm3, %v314_v13 }
 0x5a4   :  { %v417_v14 = vpop.xlane.xlu1 %416 }
 0x5a5   :  { %1413 = vrcp.f32 %v417_v14 }
 0x5ab   :  { %v1414_v15 = vpop.eup %1413 }
 0x5ac   :  { %v419_v16 = vmul.f32 %v1414_v15, %v1412_v7 }
 0x5ae   :  { %1341 = vmatmul.msk.f32.vlgmr.msra.gmra.mxu3 %vm206_vm12, %v419_v16 }
 0x5fe   :  { %v480_v19 = vpop.f32.mrf.mxu2 }
 0x5ff   :  { %v481_v20 = vadd.f32 %v1385_v18, %v480_v19  ;;  %v1647_v19 = vld [vmem:[#allocation2 + $0x128] ss:$0 sm:$0xff] }
 0x601   :  { %v486_v21 = vadd.f32 %v481_v20, %v1567_v5  ;;  %v542_v5 = vld [vmem:[#allocation2 + $0xd8] sm:$0xff] }
 0x602   :  { %563 = vmatpush.msra.mxu0 %v542_v5 }
 0x603   :  { %v489_v22 = vsel %vm84_vm3, %v486_v21, 0.0 }
 0x604   :  { %490 = vadd.xlane.f32.xlu2 %v489_v22  ;;  %564 = vmatpush.msra.mxu0 %v541_v32 }
 0x606   :  { %565 = vmatpush.msra.mxu0 %v540_v33 }
 0x608   :  { %566 = vmatpush.msra.mxu0 %v539_v34 }
 0x631   :  { %v443_v23 = vpop.f32.mrf.mxu3 }
 0x632   :  { %447 = vrot.lane.b32.xlu0 %v443_v23, %s1526_s23 }
 0x677   :  { %v491_v24 = vpop.xlane.xlu2 %490 }
 0x678   :  { %v495_v25 = vmul.f32 %v491_v24, %v1559_v31 }
 0x67a   :  { %v497_v26 = vsub.f32 %v486_v21, %v495_v25 }
 0x67c   :  { %v499_v27 = vmul.f32 %v497_v26, %v497_v26 }
 0x67e   :  { %v501_v28 = vsel %vm84_vm3, %v499_v27, 0.0 }
 0x67f   :  { %502 = vadd.xlane.f32.xlu0 %v501_v28 }
 0x6a4   :  { %v448_v29 = vpop.permute.xlu0 %447 }
 0x6a5   :  { %v450_v30 = vsel %vm180_vm11, %v377_v17, %v448_v29 }
 0x6a6   :  { %1343 = vmatmul.msk.f32.gmra.mxu2 %vm84_vm3, %v450_v30 }
 0x6f2   :  { %v503_v35 = vpop.xlane.xlu0 %502 }
 0x6f3   :  { %v507_v36 = vmul.f32 %v503_v35, %v1559_v31 }
 0x6f5   :  { %v509_v37 = vadd.f32 1e-12, %v507_v36 }
 0x6f7   :  { %1415 = vrsqrt.f32 %v509_v37  ;;  %vm517_vm14 = vweird.f32 %v509_v37 }
 0x6fd   :  { %v1416_v38 = vpop.eup %1415 }
 0x6fe   :  { %v512_v39 = vmul.f32 %v1416_v38, %v509_v37  ;;  %vm518_vm13 = vweird.f32 %v1416_v38 }
 0x6ff   :  { %vm519_vm15 = vmor %vm517_vm14, %vm518_vm13 }
 0x700   :  { %v513_v40 = vmul.f32 %v1416_v38, %v512_v39 }
 0x702   :  { %v514_v41 = vmul.f32 0.5, %v513_v40 }
 0x704   :  { %v515_v43 = vsub.f32 1.5, %v514_v41 }
 0x706   :  { %v516_v44 = vmul.f32 %v1416_v38, %v515_v43 }
 0x708   :  { %v520_v46 = vsel %vm519_vm15, %v1416_v38, %v516_v44 }
 0x709   :  { %v531_v47 = vmul.f32 %v520_v46, %v497_v26 }
 0x70b   :  { %v534_v49 = vmul.f32 %v533_v45, %v531_v47 }
 0x70d   :  { %v537_v50 = vadd.f32 %v536_v48, %v534_v49 }
 0x70f   :  { %1344 = vmatmul.msk.f32.vlgmr.msra.gmra.mxu0 %vm84_vm3, %v537_v50 }
 0x729   :  { %v483_v51 = vpop.f32.mrf.mxu2 }
 0x72a   :  { %v484_v52 = vadd.f32 %v1385_v18, %v483_v51  ;;  %v687_v51 = vld [vmem:[#allocation2 + $0x150] sm:$0xff] }
 0x72b   :  { %708 = vmatpush.msrb.mxu3 %v687_v51 }
 0x72c   :  { %v487_v53 = vadd.f32 %v484_v52, %v1571_v10  ;;  %v1386_v10 = vld [vmem:[#allocation2 + $0xe0] ss:$0 sm:$0xff]  ;;  %v686_v52 = vld [vmem:[#allocation2 + $0x148] sm:$0xff] }
 0x72d   :  { %709 = vmatpush.msrb.mxu3 %v686_v52 }
 0x72e   :  { %v492_v54 = vsel %vm84_vm3, %v487_v53, 0.0 }
 0x72f   :  { %493 = vadd.xlane.f32.xlu1 %v492_v54  ;;  %v684_v54 = vld [vmem:[#allocation2 + $0x138] sm:$0xff] }
 0x78c   :  { %v568_v63 = vpop.f32.mrf.mxu0 }
 0x78d   :  { %v569_v0 = vadd.f32 %v1386_v10, %v568_v63 }
 0x78f   :  { %v576_v1 = vmul.f32 0.044715, %v569_v0  ;;  %v574_v8 = vmul.f32 0.5, %v569_v0 }
 0x791   :  { %v578_v2 = vmul.f32 %v576_v1, %v569_v0 }
 0x793   :  { %v580_v3 = vmul.f32 %v578_v2, %v569_v0 }
 0x795   :  { %v582_v4 = vadd.f32 %v580_v3, %v569_v0  ;;  %v678_v0 = vperm.slane %v633_v62, 0  ;;  %v681_v3 = vperm.slane %v633_v62, 1 }
 0x797   :  { %v584_v6 = vmul.f32 0.7978846, %v582_v4 }
 0x799   :  { %1417 = vtanh.f32 %v584_v6 }
 0x79f   :  { %v1418_v7 = vpop.eup %1417 }
 0x7a0   :  { %v588_v9 = vadd.f32 1.0, %v1418_v7 }
 0x7a2   :  { %v494_v11 = vpop.xlane.xlu1 %493  ;;  %v590_v12 = vmul.f32 %v588_v9, %v574_v8 }
 0x7a3   :  { %v496_v13 = vmul.f32 %v494_v11, %v1559_v31 }
 0x7a4   :  { %1346 = vmatmul.msk.f32.vlgmr.msra.gmra.mxu1 %vm53_vm0, %v590_v12  ;;  %v1388_v12 = vld [vmem:[#allocation2 + $0x158] ss:$0 sm:$0xff] }
 0x7a5   :  { %v498_v14 = vsub.f32 %v487_v53, %v496_v13  ;;  %v685_v53 = vld [vmem:[#allocation2 + $0x140] sm:$0xff] }
 0x7a6   :  { %710 = vmatpush.msrb.mxu3 %v685_v53 }
 0x7a7   :  { %v500_v15 = vmul.f32 %v498_v14, %v498_v14 }
 0x7a8   :  { %711 = vmatpush.msrb.mxu3 %v684_v54 }
 0x7a9   :  { %v504_v16 = vsel %vm84_vm3, %v500_v15, 0.0 }
 0x7aa   :  { %505 = vadd.xlane.f32.xlu1 %v504_v16 }
 0x81d   :  { %v506_v17 = vpop.xlane.xlu1 %505 }
 0x81e   :  { %v508_v18 = vmul.f32 %v506_v17, %v1559_v31 }
 0x820   :  { %v510_v20 = vadd.f32 1e-12, %v508_v18 }
 0x821   :  { %v625_v21 = vpop.f32.mrf.mxu1 }
 0x822   :  { %1419 = vrsqrt.f32 %v510_v20  ;;  %v626_v22 = vadd.f32 %v1647_v19, %v625_v21  ;;  %vm527_vm2 = vweird.f32 %v510_v20 }
 0x824   :  { %v631_v23 = vadd.f32 %v626_v22, %v537_v50 }
 0x826   :  { %v634_v24 = vsel %vm84_vm3, %v631_v23, 0.0 }
 0x827   :  { %635 = vadd.xlane.f32.xlu2 %v634_v24 }
 0x828   :  { %v1420_v25 = vpop.eup %1419 }
 0x829   :  { %v522_v26 = vmul.f32 %v1420_v25, %v510_v20  ;;  %vm528_vm1 = vweird.f32 %v1420_v25 }
 0x82a   :  { %vm529_vm4 = vmor %vm527_vm2, %vm528_vm1 }
 0x82b   :  { %v523_v27 = vmul.f32 %v1420_v25, %v522_v26 }
 0x82d   :  { %v524_v28 = vmul.f32 0.5, %v523_v27 }
 0x82f   :  { %v525_v29 = vsub.f32 1.5, %v524_v28 }
 0x831   :  { %v526_v30 = vmul.f32 %v1420_v25, %v525_v29 }
 0x833   :  { %v530_v5 = vsel %vm529_vm4, %v1420_v25, %v526_v30 }
 0x834   :  { %v532_v32 = vmul.f32 %v530_v5, %v498_v14 }
 0x836   :  { %v535_v33 = vmul.f32 %v533_v45, %v532_v32 }
 0x838   :  { %v538_v34 = vadd.f32 %v536_v48, %v535_v33 }
 0x83a   :  { %1345 = vmatmul.msk.f32.gmra.mxu0 %vm84_vm3, %v538_v34 }
 0x89a   :  { %v636_v35 = vpop.xlane.xlu2 %635 }
 0x89b   :  { %v640_v36 = vmul.f32 %v636_v35, %v1559_v31 }
 0x89d   :  { %v642_v37 = vsub.f32 %v631_v23, %v640_v36 }
 0x89f   :  { %v644_v38 = vmul.f32 %v642_v37, %v642_v37 }
 0x8a1   :  { %v646_v39 = vsel %vm84_vm3, %v644_v38, 0.0 }
 0x8a2   :  { %647 = vadd.xlane.f32.xlu1 %v646_v39 }
 0x8b7   :  { %v571_v40 = vpop.f32.mrf.mxu0 }
 0x8b8   :  { %v572_v41 = vadd.f32 %v1386_v10, %v571_v40 }
 0x8ba   :  { %v577_v43 = vmul.f32 0.044715, %v572_v41  ;;  %v575_v48 = vmul.f32 0.5, %v572_v41 }
 0x8bc   :  { %v579_v44 = vmul.f32 %v577_v43, %v572_v41 }
 0x8be   :  { %v581_v46 = vmul.f32 %v579_v44, %v572_v41 }
 0x8c0   :  { %v583_v47 = vadd.f32 %v581_v46, %v572_v41 }
 0x8c2   :  { %v585_v45 = vmul.f32 0.7978846, %v583_v47 }
 0x8c4   :  { %1421 = vtanh.f32 %v585_v45 }
 0x8ca   :  { %v1422_v42 = vpop.eup %1421 }
 0x8cb   :  { %v589_v49 = vadd.f32 1.0, %v1422_v42 }
 0x8cd   :  { %v591_v50 = vmul.f32 %v589_v49, %v575_v48 }
 0x8cf   :  { %1347 = vmatmul.msk.f32.gmra.mxu1 %vm53_vm0, %v591_v50 }
 0x915   :  { %v648_v55 = vpop.xlane.xlu1 %647 }
 0x916   :  { %v652_v56 = vmul.f32 %v648_v55, %v1559_v31 }
 0x918   :  { %v654_v57 = vadd.f32 1e-12, %v652_v56 }
 0x91a   :  { %1423 = vrsqrt.f32 %v654_v57  ;;  %vm662_vm6 = vweird.f32 %v654_v57 }
 0x920   :  { %v1424_v58 = vpop.eup %1423 }
 0x921   :  { %v657_v59 = vmul.f32 %v1424_v58, %v654_v57  ;;  %vm663_vm5 = vweird.f32 %v1424_v58 }
 0x922   :  { %vm664_vm7 = vmor %vm662_vm6, %vm663_vm5 }
 0x923   :  { %v658_v60 = vmul.f32 %v1424_v58, %v657_v59 }
 0x925   :  { %v659_v61 = vmul.f32 0.5, %v658_v60 }
 0x927   :  { %v660_v10 = vsub.f32 1.5, %v659_v61 }
 0x929   :  { %v661_v63 = vmul.f32 %v1424_v58, %v660_v10 }
 0x92b   :  { %v665_v1 = vsel %vm664_vm7, %v1424_v58, %v661_v63 }
 0x92c   :  { %v676_v2 = vmul.f32 %v665_v1, %v642_v37 }
 0x92e   :  { %v679_v4 = vmul.f32 %v678_v0, %v676_v2 }
 0x930   :  { %v1660_v6 = vadd.f32 %v681_v3, %v679_v4 }
 0x932   :  { %1348 = vmatmul.msk.f32.vlgmr.msrb.gmra.mxu3 %vm84_vm3, %v1660_v6 }
 0x94c   :  { %v628_v7 = vpop.f32.mrf.mxu1 }
 0x94d   :  { %v629_v8 = vadd.f32 %v1647_v19, %v628_v7 }
 0x94f   :  { %v632_v9 = vadd.f32 %v629_v8, %v538_v34 }
 0x951   :  { %v637_v11 = vsel %vm84_vm3, %v632_v9, 0.0 }
 0x952   :  { %638 = vadd.xlane.f32.xlu2 %v637_v11 }
 0x9b5   :  { %v713_v13 = vpop.f32.mrf.mxu3 }
 0x9b6   :  { %v1666_v14 = vadd.f32 %v1388_v12, %v713_v13 }
 0x9b8   :  { %786 = vrot.lane.b32.xlu0 %v1666_v14, %s1522_s19  ;;  %720 = vrot.lane.b32.xlu2 %v1666_v14, %s1523_s20 }
 0x9c5   :  { %v639_v15 = vpop.xlane.xlu2 %638 }
 0x9c6   :  { %v641_v16 = vmul.f32 %v639_v15, %v1559_v31 }
 0x9c8   :  { %v643_v17 = vsub.f32 %v632_v9, %v641_v16 }
 0x9ca   :  { %v645_v18 = vmul.f32 %v643_v17, %v643_v17 }
 0x9cc   :  { %v649_v19 = vsel %vm84_vm3, %v645_v18, 0.0 }
 0x9cd   :  { %650 = vadd.xlane.f32.xlu1 %v649_v19 }
 0xa12   :  { %v721_v20 = vpop.permute.xlu2 %720 }
 0xa13   :  { %1350 = vmatpush.xpose.msk.msra.mxu2 %vm180_vm11, %v721_v20 }
 0xa16   :  { %1351 = vmatmul.msk.f32.vlgmr.msra.gmra.mxu2 %vm180_vm11, %v1666_v14 }
 0xa2a   :  { %v787_v21 = vpop.permute.xlu0 %786 }
 0xa2b   :  { %1353 = vmatpush.xpose.msk.msra.mxu3 %vm180_vm11, %v787_v21 }
 0xa40   :  { %v651_v22 = vpop.xlane.xlu1 %650 }
 0xa41   :  { %v653_v23 = vmul.f32 %v651_v22, %v1559_v31 }
 0xa43   :  { %v655_v24 = vadd.f32 1e-12, %v653_v23 }
 0xa45   :  { %1425 = vrsqrt.f32 %v655_v24  ;;  %vm672_vm9 = vweird.f32 %v655_v24 }
 0xa4b   :  { %v1426_v25 = vpop.eup %1425 }
 0xa4c   :  { %v667_v26 = vmul.f32 %v1426_v25, %v655_v24  ;;  %vm673_vm8 = vweird.f32 %v1426_v25 }
 0xa4d   :  { %vm674_vm10 = vmor %vm672_vm9, %vm673_vm8 }
 0xa4e   :  { %v668_v27 = vmul.f32 %v1426_v25, %v667_v26  ;;  %v994_v26 = vld [vmem:[#allocation2 + $0x178] sm:$0xff] }
 0xa50   :  { %v669_v28 = vmul.f32 0.5, %v668_v27  ;;  %v993_v27 = vld [vmem:[#allocation2 + $0x170] sm:$0xff] }
 0xa52   :  { %v670_v29 = vsub.f32 1.5, %v669_v28 }
 0xa54   :  { %v671_v30 = vmul.f32 %v1426_v25, %v670_v29  ;;  %v992_v29 = vld [vmem:[#allocation2 + $0x168] sm:$0xff] }
 0xa56   :  { %v675_v5 = vsel %vm674_vm10, %v1426_v25, %v671_v30 }
 0xa57   :  { %v677_v32 = vmul.f32 %v675_v5, %v643_v17 }
 0xa59   :  { %v680_v33 = vmul.f32 %v678_v0, %v677_v32 }
 0xa5b   :  { %v1679_v34 = vadd.f32 %v681_v3, %v680_v33  ;;  %v991_v33 = vld [vmem:[#allocation2 + $0x160] sm:$0xff] }
 0xa5d   :  { %1349 = vmatmul.msk.f32.gmra.mxu3 %vm84_vm3, %v1679_v34 }
 0xa99   :  { %v743_v35 = vpop.f32.mrf.mxu2 }
 0xa9a   :  { %v746_v36 = vmul.f32 0.25, %v743_v35 }
 0xa9c   :  { %v747_v37 = vsel %vm206_vm12, %v746_v36, -inf }
 0xa9d   :  { %748 = vmax.xlane.f32.xlu1 %v747_v37 }
 0xab6   :  { %784 = vrot.lane.b32.xlu1 %v1666_v14, %s1521_s0 }
 0xabe   :  { %758 = vrot.lane.b32.xlu1 %v1666_v14, %s1525_s22 }
 0xae0   :  { %v716_v38 = vpop.f32.mrf.mxu3 }
 0xae1   :  { %v1688_v39 = vadd.f32 %v1388_v12, %v716_v38 }
 0xae3   :  { %920 = vrot.lane.b32.xlu0 %v1688_v39, %s1521_s0  ;;  %922 = vrot.lane.b32.xlu2 %v1688_v39, %s1522_s19 }
 0xaeb   :  { %856 = vrot.lane.b32.xlu0 %v1688_v39, %s1523_s20 }
 0xb10   :  { %v749_v40 = vpop.xlane.xlu1 %748 }
 0xb11   :  { %v750_v41 = vsub.f32 %v746_v36, %v749_v40  ;;  %v1389_v40 = vld [vmem:[#allocation2 + $0x180] ss:$0 sm:$0xff] }
 0xb13   :  { %v751_v43 = vmul.f32 1.442695, %v750_v41 }
 0xb15   :  { %1427 = vpow2.f32 %v751_v43 }
 0xb1b   :  { %v1428_v44 = vpop.eup %1427 }
 0xb1c   :  { %v753_v46 = vsel %vm206_vm12, %v1428_v44, 0.0 }
 0xb1d   :  { %754 = vadd.xlane.f32.xlu2 %v753_v46 }
 0xb28   :  { %v785_v47 = vpop.permute.xlu1 %784 }
 0xb29   :  { %1354 = vmatmul.msk.f32.vlgmr.msra.gmra.mxu3 %vm180_vm11, %v785_v47 }
 0xb30   :  { %v759_v45 = vpop.permute.xlu1 %758 }
 0xb31   :  { %779 = vmatpush.msrb.mxu0 %v759_v45 }
 0xb3d   :  { %v923_v42 = vpop.permute.xlu2 %922 }
 0xb3e   :  { %1359 = vmatpush.xpose.msk.msrb.mxu3 %vm180_vm11, %v923_v42 }
 0xb55   :  { %v921_v48 = vpop.permute.xlu0 %920 }
 0xb56   :  { %1360 = vmatmul.msk.f32.vlgmr.msrb.gmra.mxu3 %vm180_vm11, %v921_v48 }
 0xb5d   :  { %v857_v49 = vpop.permute.xlu0 %856 }
 0xb5e   :  { %1356 = vmatpush.xpose.msk.msra.mxu0 %vm180_vm11, %v857_v49 }
 0xb90   :  { %v755_v50 = vpop.xlane.xlu2 %754 }
 0xb91   :  { %1429 = vrcp.f32 %v755_v50 }
 0xb97   :  { %v1430_v51 = vpop.eup %1429 }
 0xb98   :  { %v757_v52 = vmul.f32 %v1430_v51, %v1428_v44 }
 0xb9a   :  { %1352 = vmatmul.msk.f32.vlgmr.msrb.gmra.mxu0 %vm206_vm12, %v757_v52 }
 0xb9b   :  { %1015 = vmatpush.msrb.mxu0 %v994_v26 }
 0xb9d   :  { %1016 = vmatpush.msrb.mxu0 %v993_v27 }
 0xb9f   :  { %1017 = vmatpush.msrb.mxu0 %v992_v29  ;;  %v1138_v29 = vld [vmem:[#allocation2 + $0x1e8] sm:$0xff] }
 0xba1   :  { %1018 = vmatpush.msrb.mxu0 %v991_v33  ;;  %v1134_v33 = vld [vmem:[#allocation2 + $0x1c8] sm:$0xff] }
 0xba2   :  { %1357 = vmatmul.msk.f32.vlgmr.msra.gmra.mxu0 %vm180_vm11, %v1688_v39 }
 0xbac   :  { %v809_v53 = vpop.f32.mrf.mxu3 }
 0xbad   :  { %v812_v54 = vmul.f32 0.25, %v809_v53 }
 0xbaf   :  { %v813_v55 = vsel %vm206_vm12, %v812_v54, -inf }
 0xbb0   :  { %814 = vmax.xlane.f32.xlu1 %v813_v55 }
 0xbd9   :  { %v945_v56 = vpop.f32.mrf.mxu3 }
 0xbda   :  { %v948_v57 = vmul.f32 0.25, %v945_v56 }
 0xbdc   :  { %v949_v58 = vsel %vm206_vm12, %v948_v57, -inf }
 0xbdd   :  { %950 = vmax.xlane.f32.xlu0 %v949_v58  ;;  %v1081_v58 = vld [vmem:[#allocation2 + $0x1a0] sm:$0xff] }
 0xbf1   :  { %960 = vrot.lane.b32.xlu0 %v1688_v39, %s1524_s21 }
 0xc17   :  { %v781_v61 = vpop.f32.mrf.mxu0 }
 0xc1f   :  { %v879_v0 = vpop.f32.mrf.mxu0 }
 0xc20   :  { %v882_v1 = vmul.f32 0.25, %v879_v0 }
 0xc22   :  { %v883_v2 = vsel %vm206_vm12, %v882_v1, -inf }
 0xc23   :  { %v815_v59 = vpop.xlane.xlu1 %814 }
 0xc24   :  { %v816_v60 = vsub.f32 %v812_v54, %v815_v59  ;;  %v1080_v59 = vld [vmem:[#allocation2 + $0x198] sm:$0xff] }
 0xc26   :  { %v817_v62 = vmul.f32 1.442695, %v816_v60  ;;  %v1079_v60 = vld [vmem:[#allocation2 + $0x190] sm:$0xff] }
 0xc28   :  { %1431 = vpow2.f32 %v817_v62 }
 0xc2e   :  { %v1432_v10 = vpop.eup %1431 }
 0xc2f   :  { %v819_v63 = vsel %vm206_vm12, %v1432_v10, 0.0 }
 0xc30   :  { %820 = vadd.xlane.f32.xlu2 %v819_v63 }
 0xc38   :  { %884 = vmax.xlane.f32.xlu2 %v883_v2 }
 0xc50   :  { %v951_v3 = vpop.xlane.xlu0 %950  ;;  %824 = vrot.lane.b32.xlu2 %v1666_v14, %s1524_s21 }
 0xc51   :  { %v952_v4 = vsub.f32 %v948_v57, %v951_v3  ;;  %v1028_v3 = vld [vmem:[#allocation2 + $0x188] sm:$0x3] }
 0xc53   :  { %v953_v7 = vmul.f32 1.442695, %v952_v4 }
 0xc55   :  { %1433 = vpow2.f32 %v953_v7 }
 0xc5b   :  { %v1434_v8 = vpop.eup %1433 }
 0xc5c   :  { %v955_v9 = vsel %vm206_vm12, %v1434_v8, 0.0 }
 0xc5d   :  { %956 = vadd.xlane.f32.xlu1 %v955_v9 }
 0xc63   :  { %v961_v19 = vpop.permute.xlu0 %960 }
 0xca3   :  { %v821_v11 = vpop.xlane.xlu2 %820 }
 0xca4   :  { %1435 = vrcp.f32 %v821_v11 }
 0xcaa   :  { %v1436_v16 = vpop.eup %1435 }
 0xcab   :  { %v885_v12 = vpop.xlane.xlu2 %884  ;;  %v823_v17 = vmul.f32 %v1436_v16, %v1432_v10 }
 0xcac   :  { %v886_v13 = vsub.f32 %v882_v1, %v885_v12 }
 0xcae   :  { %v887_v15 = vmul.f32 1.442695, %v886_v13  ;;  %v1076_v13 = vperm.slane %v1028_v3, 1 }
 0xcb0   :  { %1437 = vpow2.f32 %v887_v15 }
 0xcb3   :  { %v825_v18 = vpop.permute.xlu2 %824 }
 0xcb4   :  { %845 = vmatpush.msrb.mxu2 %v825_v18 }
 0xcb5   :  { %1355 = vmatmul.msk.f32.vlgmr.msrb.gmra.mxu2 %vm206_vm12, %v823_v17 }
 0xcb6   :  { %v1438_v14 = vpop.eup %1437  ;;  %981 = vmatpush.msra.mxu2 %v961_v19 }
 0xcb7   :  { %v889_v20 = vsel %vm206_vm12, %v1438_v14, 0.0 }
 0xcb8   :  { %890 = vadd.xlane.f32.xlu1 %v889_v20 }
 0xcd0   :  { %v957_v21 = vpop.xlane.xlu1 %956 }
 0xcd1   :  { %1439 = vrcp.f32 %v957_v21  ;;  %894 = vrot.lane.b32.xlu1 %v1688_v39, %s1525_s22 }
 0xcd7   :  { %v1440_v22 = vpop.eup %1439 }
 0xcd8   :  { %v959_v23 = vmul.f32 %v1440_v22, %v1434_v8  ;;  %v1073_v8 = vperm.slane %v1028_v3, 0 }
 0xcda   :  { %1361 = vmatmul.msk.f32.vlgmr.msra.gmra.mxu2 %vm206_vm12, %v959_v23 }
 0xd2b   :  { %v891_v24 = vpop.xlane.xlu1 %890 }
 0xd2c   :  { %1441 = vrcp.f32 %v891_v24 }
 0xd32   :  { %v1442_v28 = vpop.eup %1441 }
 0xd33   :  { %v893_v30 = vmul.f32 %v1442_v28, %v1438_v14  ;;  %v1139_v28 = vld [vmem:[#allocation2 + $0x1f0] sm:$0xff] }
 0xd34   :  { %1156 = vmatpush.msra.mxu3 %v1139_v28 }
 0xd36   :  { %1157 = vmatpush.msra.mxu3 %v1138_v29 }
 0xd38   :  { %v847_v25 = vpop.f32.mrf.mxu2 }
 0xd39   :  { %851 = vrot.lane.b32.xlu0 %v847_v25, %s1526_s23 }
 0xd43   :  { %v895_v5 = vpop.permute.xlu1 %894 }
 0xd44   :  { %915 = vmatpush.msrb.mxu1 %v895_v5  ;;  %v1136_v5 = vld [vmem:[#allocation2 + $0x1d8] sm:$0xff] }
 0xd45   :  { %1358 = vmatmul.msk.f32.vlgmr.msrb.gmra.mxu1 %vm206_vm12, %v893_v30  ;;  %v1137_v30 = vld [vmem:[#allocation2 + $0x1e0] sm:$0xff] }
 0xd46   :  { %1158 = vmatpush.msra.mxu3 %v1137_v30 }
 0xd48   :  { %1159 = vmatpush.msra.mxu3 %v1136_v5 }
 0xd5d   :  { %v983_v32 = vpop.f32.mrf.mxu2 }
 0xd5e   :  { %987 = vrot.lane.b32.xlu2 %v983_v32, %s1526_s23  ;;  %v1135_v32 = vld [vmem:[#allocation2 + $0x1d0] sm:$0xff] }
 0xd5f   :  { %1160 = vmatpush.msra.mxu3 %v1135_v32 }
 0xd61   :  { %1161 = vmatpush.msra.mxu3 %v1134_v33 }
 0xdab   :  { %v852_v35 = vpop.permute.xlu0 %851 }
 0xdac   :  { %v854_v36 = vsel %vm180_vm11, %v781_v61, %v852_v35  ;;  %v1133_v35 = vld [vmem:[#allocation2 + $0x1c0] sm:$0xff] }
 0xdad   :  { %1362 = vmatmul.msk.f32.vlgmr.msrb.gmra.mxu0 %vm84_vm3, %v854_v36  ;;  %1162 = vmatpush.msra.mxu3 %v1133_v35  ;;  %v1132_v36 = vld [vmem:[#allocation2 + $0x1b8] sm:$0xff] }
 0xdaf   :  { %1163 = vmatpush.msra.mxu3 %v1132_v36 }
 0xdb8   :  { %v988_v37 = vpop.permute.xlu2 %987 }
 0xdc2   :  { %v917_v38 = vpop.f32.mrf.mxu1 }
 0xdc3   :  { %v990_v39 = vsel %vm180_vm11, %v917_v38, %v988_v37  ;;  %v1390_v37 = vld [vmem:[#allocation2 + $0x1b0] ss:$0 sm:$0xff] }
 0xdc4   :  { %1363 = vmatmul.msk.f32.gmra.mxu0 %vm84_vm3, %v990_v39 }
 0xe2a   :  { %v1020_v41 = vpop.f32.mrf.mxu0 }
 0xe2b   :  { %v1021_v43 = vadd.f32 %v1389_v40, %v1020_v41 }
 0xe2d   :  { %v1026_v44 = vadd.f32 %v1021_v43, %v1660_v6 }
 0xe2f   :  { %v1029_v46 = vsel %vm84_vm3, %v1026_v44, 0.0 }
 0xe30   :  { %1030 = vadd.xlane.f32.xlu0 %v1029_v46 }
 0xe41   :  { %v1023_v47 = vpop.f32.mrf.mxu0 }
 0xe42   :  { %v1024_v45 = vadd.f32 %v1389_v40, %v1023_v47 }
 0xe44   :  { %v1027_v42 = vadd.f32 %v1024_v45, %v1679_v34  ;;  %v1082_v34 = vld [vmem:[#allocation2 + $0x1a8] sm:$0xff] }
 0xe45   :  { %1103 = vmatpush.msra.mxu1 %v1082_v34 }
 0xe46   :  { %v1032_v48 = vsel %vm84_vm3, %v1027_v42, 0.0 }
 0xe47   :  { %1033 = vadd.xlane.f32.xlu2 %v1032_v48  ;;  %1104 = vmatpush.msra.mxu1 %v1081_v58  ;;  %v1391_v58 = vld [vmem:[#allocation2 + $0x1f8] ss:$0 sm:$0xff] }
 0xe49   :  { %1105 = vmatpush.msra.mxu1 %v1080_v59 }
 0xe4b   :  { %1106 = vmatpush.msra.mxu1 %v1079_v60 }
 0xea3   :  { %v1031_v49 = vpop.xlane.xlu0 %1030 }
 0xea4   :  { %v1035_v50 = vmul.f32 %v1031_v49, %v1559_v31 }
 0xea6   :  { %v1037_v51 = vsub.f32 %v1026_v44, %v1035_v50 }
 0xea8   :  { %v1039_v52 = vmul.f32 %v1037_v51, %v1037_v51 }
 0xeaa   :  { %v1041_v53 = vsel %vm84_vm3, %v1039_v52, 0.0 }
 0xeab   :  { %1042 = vadd.xlane.f32.xlu1 %v1041_v53 }
 0xeba   :  { %v1034_v54 = vpop.xlane.xlu2 %1033 }
 0xebb   :  { %v1036_v6 = vmul.f32 %v1034_v54, %v1559_v31 }
 0xebd   :  { %v1038_v55 = vsub.f32 %v1027_v42, %v1036_v6 }
 0xebf   :  { %v1040_v56 = vmul.f32 %v1038_v55, %v1038_v55 }
 0xec1   :  { %v1044_v57 = vsel %vm84_vm3, %v1040_v56, 0.0 }
 0xec2   :  { %1045 = vadd.xlane.f32.xlu0 %v1044_v57 }
 0xf1e   :  { %v1043_v61 = vpop.xlane.xlu1 %1042 }
 0xf1f   :  { %v1047_v62 = vmul.f32 %v1043_v61, %v1559_v31 }
 0xf21   :  { %v1049_v10 = vadd.f32 1e-12, %v1047_v62 }
 0xf23   :  { %1443 = vrsqrt.f32 %v1049_v10  ;;  %vm1057_vm12 = vweird.f32 %v1049_v10 }
 0xf29   :  { %v1444_v63 = vpop.eup %1443 }
 0xf2a   :  { %v1052_v0 = vmul.f32 %v1444_v63, %v1049_v10  ;;  %vm1058_vm11 = vweird.f32 %v1444_v63 }
 0xf2b   :  { %vm1059_vm13 = vmor %vm1057_vm12, %vm1058_vm11 }
 0xf2c   :  { %v1053_v1 = vmul.f32 %v1444_v63, %v1052_v0 }
 0xf2e   :  { %v1054_v2 = vmul.f32 0.5, %v1053_v1 }
 0xf30   :  { %v1055_v4 = vsub.f32 1.5, %v1054_v2 }
 0xf32   :  { %v1056_v7 = vmul.f32 %v1444_v63, %v1055_v4 }
 0xf34   :  { %v1060_v9 = vsel %vm1059_vm13, %v1444_v63, %v1056_v7 }
 0xf35   :  { %v1071_v11 = vmul.f32 %v1060_v9, %v1037_v51  ;;  %v1046_v12 = vpop.xlane.xlu0 %1045 }
 0xf36   :  { %v1048_v15 = vmul.f32 %v1046_v12, %v1559_v31 }
 0xf37   :  { %v1074_v16 = vmul.f32 %v1073_v8, %v1071_v11 }
 0xf38   :  { %v1050_v17 = vadd.f32 1e-12, %v1048_v15 }
 0xf39   :  { %v1735_v18 = vadd.f32 %v1076_v13, %v1074_v16  ;;  %v1227_v16 = vld [vmem:[#allocation2 + $0x220] sm:$0xff] }
 0xf3a   :  { %1445 = vrsqrt.f32 %v1050_v17  ;;  %vm1067_vm15 = vweird.f32 %v1050_v17  ;;  %1248 = vmatpush.msrb.mxu2 %v1227_v16 }
 0xf3b   :  { %1364 = vmatmul.msk.f32.vlgmr.msra.gmra.mxu1 %vm84_vm3, %v1735_v18 }
 0xf40   :  { %v1446_v19 = vpop.eup %1445 }
 0xf41   :  { %v1062_v14 = vmul.f32 %v1446_v19, %v1050_v17  ;;  %vm1068_vm14 = vweird.f32 %v1446_v19  ;;  %v1226_v17 = vld [vmem:[#allocation2 + $0x218] sm:$0xff] }
 0xf42   :  { %vm1069_vm1 = vmor %vm1067_vm15, %vm1068_vm14  ;;  %1249 = vmatpush.msrb.mxu2 %v1226_v17 }
 0xf43   :  { %v1063_v20 = vmul.f32 %v1446_v19, %v1062_v14 }
 0xf45   :  { %v1064_v21 = vmul.f32 0.5, %v1063_v20 }
 0xf47   :  { %v1065_v22 = vsub.f32 1.5, %v1064_v21 }
 0xf49   :  { %v1066_v23 = vmul.f32 %v1446_v19, %v1065_v22 }
 0xf4b   :  { %v1070_v24 = vsel %vm1069_vm1, %v1446_v19, %v1066_v23  ;;  %v1224_v19 = vld [vmem:[#allocation2 + $0x208] sm:$0xff] }
 0xf4c   :  { %v1072_v25 = vmul.f32 %v1070_v24, %v1038_v55 }
 0xf4e   :  { %v1075_v26 = vmul.f32 %v1073_v8, %v1072_v25 }
 0xf50   :  { %v1078_v27 = vadd.f32 %v1076_v13, %v1075_v26  ;;  %v1173_v26 = vld [vmem:[#allocation2 + $0x200] sm:$0x3] }
 0xf51   :  { %v1218_v29 = vperm.slane %v1173_v26, 0  ;;  %v1221_v33 = vperm.slane %v1173_v26, 1 }
 0xf52   :  { %1365 = vmatmul.msk.f32.gmra.mxu1 %vm84_vm3, %v1078_v27 }
 0xfb8   :  { %v1108_v38 = vpop.f32.mrf.mxu1 }
 0xfb9   :  { %v1109_v39 = vadd.f32 %v1390_v37, %v1108_v38 }
 0xfbb   :  { %v1116_v40 = vmul.f32 0.044715, %v1109_v39  ;;  %v1114_v45 = vmul.f32 0.5, %v1109_v39 }
 0xfbd   :  { %v1118_v41 = vmul.f32 %v1116_v40, %v1109_v39 }
 0xfbf   :  { %v1120_v43 = vmul.f32 %v1118_v41, %v1109_v39 }
 0xfc1   :  { %v1122_v44 = vadd.f32 %v1120_v43, %v1109_v39 }
 0xfc3   :  { %v1124_v46 = vmul.f32 0.7978846, %v1122_v44 }
 0xfc5   :  { %1447 = vtanh.f32 %v1124_v46 }
 0xfcb   :  { %v1448_v47 = vpop.eup %1447 }
 0xfcc   :  { %v1128_v42 = vadd.f32 1.0, %v1448_v47 }
 0xfce   :  { %v1130_v48 = vmul.f32 %v1128_v42, %v1114_v45 }
 0xfcf   :  { %v1111_v49 = vpop.f32.mrf.mxu1 }
 0xfd0   :  { %v1112_v50 = vadd.f32 %v1390_v37, %v1111_v49  ;;  %1366 = vmatmul.msk.f32.vlgmr.msra.gmra.mxu3 %vm53_vm0, %v1130_v48 }
 0xfd2   :  { %v1117_v51 = vmul.f32 0.044715, %v1112_v50  ;;  %v1115_v56 = vmul.f32 0.5, %v1112_v50 }
 0xfd4   :  { %v1119_v52 = vmul.f32 %v1117_v51, %v1112_v50 }
 0xfd6   :  { %v1121_v53 = vmul.f32 %v1119_v52, %v1112_v50 }
 0xfd8   :  { %v1123_v54 = vadd.f32 %v1121_v53, %v1112_v50 }
 0xfda   :  { %v1125_v6 = vmul.f32 0.7978846, %v1123_v54 }
 0xfdc   :  { %1449 = vtanh.f32 %v1125_v6 }
 0xfe2   :  { %v1450_v55 = vpop.eup %1449 }
 0xfe3   :  { %v1129_v57 = vadd.f32 1.0, %v1450_v55 }
 0xfe5   :  { %v1131_v34 = vmul.f32 %v1129_v57, %v1115_v56 }
 0xfe7   :  { %1367 = vmatmul.msk.f32.gmra.mxu3 %vm53_vm0, %v1131_v34 }
0x1053   :  { %v1165_v59 = vpop.f32.mrf.mxu3 }
0x1054   :  { %v1166_v60 = vadd.f32 %v1391_v58, %v1165_v59 }
0x1056   :  { %v1171_v61 = vadd.f32 %v1166_v60, %v1735_v18  ;;  %v1225_v18 = vld [vmem:[#allocation2 + $0x210] sm:$0xff] }
0x1057   :  { %1250 = vmatpush.msrb.mxu2 %v1225_v18 }
0x1058   :  { %v1174_v62 = vsel %vm84_vm3, %v1171_v61, 0.0 }
0x1059   :  { %1175 = vadd.xlane.f32.xlu2 %v1174_v62  ;;  %1251 = vmatpush.msrb.mxu2 %v1224_v19 }
0x106a   :  { %v1168_v10 = vpop.f32.mrf.mxu3 }
0x106b   :  { %v1169_v63 = vadd.f32 %v1391_v58, %v1168_v10 }
0x106d   :  { %v1172_v0 = vadd.f32 %v1169_v63, %v1078_v27 }
0x106f   :  { %v1177_v1 = vsel %vm84_vm3, %v1172_v0, 0.0 }
0x1070   :  { %1178 = vadd.xlane.f32.xlu0 %v1177_v1 }
0x10cc   :  { %v1176_v2 = vpop.xlane.xlu2 %1175 }
0x10cd   :  { %v1180_v3 = vmul.f32 %v1176_v2, %v1559_v31 }
0x10cf   :  { %v1182_v4 = vsub.f32 %v1171_v61, %v1180_v3 }
0x10d1   :  { %v1184_v7 = vmul.f32 %v1182_v4, %v1182_v4 }
0x10d3   :  { %v1186_v8 = vsel %vm84_vm3, %v1184_v7, 0.0 }
0x10d4   :  { %1187 = vadd.xlane.f32.xlu1 %v1186_v8 }
0x10e3   :  { %v1179_v9 = vpop.xlane.xlu0 %1178 }
0x10e4   :  { %v1181_v11 = vmul.f32 %v1179_v9, %v1559_v31 }
0x10e6   :  { %v1183_v12 = vsub.f32 %v1172_v0, %v1181_v11 }
0x10e8   :  { %v1185_v13 = vmul.f32 %v1183_v12, %v1183_v12 }
0x10ea   :  { %v1189_v15 = vsel %vm84_vm3, %v1185_v13, 0.0 }
0x10eb   :  { %1190 = vadd.xlane.f32.xlu2 %v1189_v15 }
0x1147   :  { %v1188_v14 = vpop.xlane.xlu1 %1187 }
0x1148   :  { %v1192_v20 = vmul.f32 %v1188_v14, %v1559_v31 }
0x114a   :  { %v1194_v21 = vadd.f32 1e-12, %v1192_v20 }
0x114c   :  { %1451 = vrsqrt.f32 %v1194_v21  ;;  %vm1202_vm2 = vweird.f32 %v1194_v21 }
0x1152   :  { %v1452_v22 = vpop.eup %1451 }
0x1153   :  { %v1197_v23 = vmul.f32 %v1452_v22, %v1194_v21  ;;  %vm1203_vm0 = vweird.f32 %v1452_v22 }
0x1154   :  { %vm1204_vm4 = vmor %vm1202_vm2, %vm1203_vm0 }
0x1155   :  { %v1198_v24 = vmul.f32 %v1452_v22, %v1197_v23 }
0x1157   :  { %v1199_v25 = vmul.f32 0.5, %v1198_v24 }
0x1159   :  { %v1200_v27 = vsub.f32 1.5, %v1199_v25 }
0x115b   :  { %v1201_v28 = vmul.f32 %v1452_v22, %v1200_v27 }
0x115d   :  { %v1205_v30 = vsel %vm1204_vm4, %v1452_v22, %v1201_v28 }
0x115e   :  { %v1216_v5 = vmul.f32 %v1205_v30, %v1182_v4  ;;  %v1191_v32 = vpop.xlane.xlu2 %1190 }
0x115f   :  { %v1193_v35 = vmul.f32 %v1191_v32, %v1559_v31  ;;  %v1392_v31 = vld [vmem:[#allocation2 + $0x228] ss:$0 sm:$0xff] }
0x1160   :  { %v1219_v36 = vmul.f32 %v1218_v29, %v1216_v5 }
0x1161   :  { %v1195_v37 = vadd.f32 1e-12, %v1193_v35 }
0x1162   :  { %v1222_v38 = vadd.f32 %v1221_v33, %v1219_v36 }
0x1163   :  { %1453 = vrsqrt.f32 %v1195_v37  ;;  %vm1212_vm6 = vweird.f32 %v1195_v37 }
0x1164   :  { %1368 = vmatmul.msk.f32.vlgmr.msrb.gmra.mxu2 %vm84_vm3, %v1222_v38 }
0x1169   :  { %v1454_v39 = vpop.eup %1453 }
0x116a   :  { %v1207_v40 = vmul.f32 %v1454_v39, %v1195_v37  ;;  %vm1213_vm5 = vweird.f32 %v1454_v39 }
0x116b   :  { %vm1214_vm7 = vmor %vm1212_vm6, %vm1213_vm5 }
0x116c   :  { %v1208_v41 = vmul.f32 %v1454_v39, %v1207_v40 }
0x116e   :  { %v1209_v43 = vmul.f32 0.5, %v1208_v41 }
0x1170   :  { %v1210_v44 = vsub.f32 1.5, %v1209_v43 }
0x1172   :  { %v1211_v46 = vmul.f32 %v1454_v39, %v1210_v44 }
0x1174   :  { %v1215_v47 = vsel %vm1214_vm7, %v1454_v39, %v1211_v46 }
0x1175   :  { %v1217_v45 = vmul.f32 %v1215_v47, %v1183_v12 }
0x1177   :  { %v1220_v42 = vmul.f32 %v1218_v29, %v1217_v45 }
0x1179   :  { %v1223_v48 = vadd.f32 %v1221_v33, %v1220_v42 }
0x117b   :  { %1369 = vmatmul.msk.f32.gmra.mxu2 %vm84_vm3, %v1223_v48 }
0x11e7   :  { %v1253_v49 = vpop.f32.mrf.mxu2 }
0x11e8   :  { %v1254_v50 = vadd.f32 %v1392_v31, %v1253_v49 }
0x11ea   :  { %1259 = vmax.xlane.f32.xlu0 %v1254_v50 }
0x11fe   :  { %v1256_v51 = vpop.f32.mrf.mxu2 }
0x11ff   :  { %v1257_v52 = vadd.f32 %v1392_v31, %v1256_v51 }
0x1201   :  { %1261 = vmax.xlane.f32.xlu1 %v1257_v52 }
0x125d   :  { %v1260_v53 = vpop.xlane.xlu0 %1259 }
0x125e   :  { %v1263_v54 = vsub.f32 %v1254_v50, %v1260_v53 }
0x1260   :  { %v1265_v6 = vmul.f32 1.442695, %v1263_v54 }
0x1262   :  { %1455 = vpow2.f32 %v1265_v6 }
0x1268   :  { %v1456_v55 = vpop.eup %1455 }
0x1269   :  { %1269 = vadd.xlane.f32.xlu2 %v1456_v55 }
0x1274   :  { %v1262_v56 = vpop.xlane.xlu1 %1261 }
0x1275   :  { %v1264_v57 = vsub.f32 %v1257_v52, %v1262_v56 }
0x1277   :  { %v1267_v34 = vmul.f32 1.442695, %v1264_v57 }
0x1279   :  { %1457 = vpow2.f32 %v1267_v34 }
0x127f   :  { %v1458_v58 = vpop.eup %1457 }
0x1280   :  { %1271 = vadd.xlane.f32.xlu0 %v1458_v58 }
0x12dc   :  { %v1270_v59 = vpop.xlane.xlu2 %1269 }
0x12dd   :  { %1459 = vrcp.f32 %v1270_v59  ;;  %v1284_v10 = vand.u32 2147483648, %v1270_v59  ;;  %v1282_v0 = vand.u32 2147483647, %v1270_v59  ;;  %vm1278_vm8 = vweird.f32 %v1270_v59 }
0x12df   :  { %v1285_v2 = vor.u32 1.1754944e-38, %v1284_v10  ;;  %vm1283_vm10 = vcmp.eq.f32.partialorder %v1282_v0, 8.507059e+37 }
0x12e3   :  { %v1460_v60 = vpop.eup %1459 }
0x12e4   :  { %v1274_v61 = vmul.f32 %v1460_v60, %v1270_v59  ;;  %vm1279_vm3 = vweird.f32 %v1460_v60 }
0x12e5   :  { %vm1280_vm9 = vmor %vm1278_vm8, %vm1279_vm3 }
0x12e6   :  { %v1275_v62 = vsub.f32 1.0, %v1274_v61 }
0x12e8   :  { %v1276_v63 = vmul.f32 %v1460_v60, %v1275_v62 }
0x12ea   :  { %v1277_v1 = vadd.f32 %v1460_v60, %v1276_v63 }
0x12ec   :  { %v1281_v3 = vsel %vm1280_vm9, %v1460_v60, %v1277_v1 }
0x12ed   :  { %v1286_v4 = vsel %vm1283_vm10, %v1285_v2, %v1281_v3 }
0x12ee   :  { %v1287_v7 = vmul.f32 %v1456_v55, %v1286_v4 }
0x12f0   :  { %1303 = vst [vmem:[#allocation5] sm:$0xff] %v1287_v7 }
0x12f3   :  { %v1272_v8 = vpop.xlane.xlu0 %1271 }
0x12f4   :  { %1461 = vrcp.f32 %v1272_v8  ;;  %v1299_v13 = vand.u32 2147483648, %v1272_v8  ;;  %v1297_v16 = vand.u32 2147483647, %v1272_v8  ;;  %vm1293_vm12 = vweird.f32 %v1272_v8 }
0x12f6   :  { %v1300_v18 = vor.u32 1.1754944e-38, %v1299_v13  ;;  %vm1298_vm14 = vcmp.eq.f32.partialorder %v1297_v16, 8.507059e+37 }
0x12fa   :  { %v1462_v9 = vpop.eup %1461 }
0x12fb   :  { %v1289_v11 = vmul.f32 %v1462_v9, %v1272_v8  ;;  %vm1294_vm11 = vweird.f32 %v1462_v9 }
0x12fc   :  { %vm1295_vm13 = vmor %vm1293_vm12, %vm1294_vm11 }
0x12fd   :  { %v1290_v12 = vsub.f32 1.0, %v1289_v11 }
0x12ff   :  { %v1291_v15 = vmul.f32 %v1462_v9, %v1290_v12 }
0x1301   :  { %v1292_v17 = vadd.f32 %v1462_v9, %v1291_v15 }
0x1303   :  { %v1296_v19 = vsel %vm1295_vm13, %v1462_v9, %v1292_v17 }
0x1304   :  { %v1301_v14 = vsel %vm1298_vm14, %v1300_v18, %v1296_v19 }
0x1305   :  { %v1302_v20 = vmul.f32 %v1458_v58, %v1301_v14 }
0x1307   :  { %1304 = vst [vmem:[#allocation5 + $0x8] sm:$0xff] %v1302_v20 }
0x1308   :  { %1317 = dma.vmem_to_hbm [thread:$0]  %s1310_s25, 256, %s1312_s28, [#allocation4], %s1516_s14, %s1516_s14, %s1517_s15  }
0x1309   :  { %1513 = dma.done.wait [#allocation4], 256  }
0x130a   :  { %1514 = vsyncadd [#allocation4], 4294967040 }
0x130b   :  { %1322 = vsyncpa [#allocation3], 1 }
0x130c   :  { %1323 = vsyncpa [#allocation4], 1 }

</bundles_post_ra>
